<compile_context>
chip_gen: v7x
topology: tpu7x:2x2x1
jax: 0.10.0
libtpu: 0.0.40
codegen_flags: <defaults>
</compile_context>

<pallas_src>
import types

import jax
import jax.numpy as jnp
from jax.experimental import pallas as pl
from jax.experimental.pallas import tpu as pltpu

BN_EPS = 1e-3                 # norm_cfg eps (BN1d, eval mode)
LANE = 128                    # TPU lane width; kernel-side channel dims padded to this
MM_DTYPE = jnp.bfloat16       # MXU operand dtype (f32 accumulation, f32 elementwise)
DEFAULT_MAX_TILE_M = 512      # upper bound on keypoint rows per grid step


# ----------------------------------------------------------------------------
# small helpers
# ----------------------------------------------------------------------------
def _round_up(x, m):
    return (x + m - 1) // m * m


def _vmem_capacity_bytes():
    """Per-core VMEM capacity (64 MiB on v7x, 128 MiB on v5e/v6e)."""
    try:
        return int(pltpu.get_tpu_info().vmem_capacity_bytes)
    except Exception:
        return 64 << 20   # conservative (v7x) fallback


def _build_branch_mlp(key, cin, mlp_spec):
    """Conv1d(k=1, bias=False) + BN(eval) + ReLU stack.
    BN scale folded into W (W' = W * gamma/sqrt(var+eps)); output widths padded
    to 128 lanes with zeros (padded channels stay exactly 0 after ReLU)."""
    # TODO(synk): with real trained weights, fold running mean/var and beta here
    # (demo BN stats: gamma=1, beta=0, mean=0, var=1); padded bias lanes must stay 0.
    bn_scale = (1.0 + BN_EPS) ** -0.5
    layers = []
    c_prev, c_prev_pad = cin, cin
    for cout in mlp_spec:
        cout_pad = _round_up(cout, LANE)
        key, k = jax.random.split(key)
        w = jax.random.normal(k, (c_prev, cout), jnp.float32) * (2.0 / c_prev) ** 0.5
        w = w * bn_scale                                   # fold BN scale
        bias = jnp.zeros((cout,), jnp.float32)             # beta - mean*scale = 0
        w_pad = jnp.zeros((c_prev_pad, cout_pad), jnp.float32).at[:c_prev, :cout].set(w)
        b_pad = jnp.zeros((1, cout_pad), jnp.float32).at[0, :cout].set(bias)
        layers.append((w_pad.astype(MM_DTYPE), b_pad))
        c_prev, c_prev_pad = cout, cout_pad
    return key, layers, c_prev, c_prev_pad


# ----------------------------------------------------------------------------
# Fused VSA Pallas kernel
#   per grid step (tile_m keypoints):
#     for each SA branch:
#       shared MLP over the (s * tile_m) grouped rows (bf16 MXU, f32 acc)
#       unrolled max over nsample (contiguous sublane slices -> pure VPU)
#       store pooled block into the packed 128-aligned slab output
#     ONE stacked fusion dot over K = cbev_pad + sum(branch 128-slots)
#     fusion = ReLU(dot + folded-BN bias)  ->  lane-dense (tile_m, out_pad) store
# ----------------------------------------------------------------------------
def _make_vsa_fused_kernel(n_branches, have_bev, branch_nsamples,
                           branch_nlayers, branch_out_pads, tile_m):
    def kernel(*refs):
        idx = 0
        bev_ref = None
        if have_bev:
            bev_ref = refs[idx]; idx += 1
        grouped_refs = refs[idx:idx + n_branches]; idx += n_branches
        layer_refs = []
        for nl in branch_nlayers:
            layer_refs.append(refs[idx:idx + 2 * nl]); idx += 2 * nl
        wf_ref = refs[idx]; idx += 1       # stacked fusion weight (K_total, out_pad) bf16
        fbias_ref = refs[idx]; idx += 1    # (1, out_pad) f32
        slab_ref = refs[idx]               # packed pooled slab (tile_m, sum(out_pads)) f32
        fusion_ref = refs[idx + 1]         # (tile_m, out_pad) f32

        pieces = []
        if have_bev:
            pieces.append(bev_ref[...])    # (tile_m, cbev_pad) bf16, 128-aligned width

        col = 0
        for b in range(n_branches):
            s = branch_nsamples[b]
            g = grouped_refs[b][...]                           # (s, tile_m, cin) bf16
            h = g.reshape(s * tile_m, g.shape[-1])             # tile_m % 16 == 0 -> no-copy
            for l in range(branch_nlayers[b]):
                w = layer_refs[b][2 * l][...]                  # (K, N_pad) bf16
                bias = layer_refs[b][2 * l + 1][...]           # (1, N_pad) f32
                acc = jnp.dot(h.astype(MM_DTYPE), w,
                              preferred_element_type=jnp.float32)
                h = jnp.maximum(acc + bias, 0.0)               # folded BN + ReLU (f32)
            # Unrolled max-pool over nsample: sample j occupies contiguous rows
            # [j*tile_m, (j+1)*tile_m) -> pure elementwise maximum on the VPU.
            pooled = h[0:tile_m]
            for j in range(1, s):
                pooled = jnp.maximum(pooled, h[j * tile_m:(j + 1) * tile_m])
            width = branch_out_pads[b]
            slab_ref[:, col:col + width] = pooled              # 128-aligned unmasked store
            col += width
            pieces.append(pooled.astype(MM_DTYPE))

        # Single stacked fusion matmul (K = cbev_pad + n_branches*128-slots):
        # fills the 256-deep MXU and replaces per-branch dot + accumulator adds.
        stacked = pieces[0] if len(pieces) == 1 else jnp.concatenate(pieces, axis=-1)
        fus = jnp.dot(stacked, wf_ref[...], preferred_element_type=jnp.float32)
        fusion_ref[...] = jnp.maximum(fus + fbias_ref[...], 0.0)

    return kernel


def vsa_fused_forward(bev_feats, grouped_list, branch_layers, branch_couts,
                      wf_stacked, fusion_bias, out_channels,
                      max_tile_m=DEFAULT_MAX_TILE_M):
    """All SA shared-MLPs + max-pool + fusion Linear/BN/ReLU in ONE pallas_call.
    Returns (point_features (M, gathered), fusion (M, out_channels))."""
    have_bev = bev_feats is not None
    n_branches = len(grouped_list)
    assert n_branches == len(branch_layers) == len(branch_couts)
    M = bev_feats.shape[0] if have_bev else grouped_list[0].shape[0]

    branch_nsamples = [g.shape[1] for g in grouped_list]
    branch_cins = [g.shape[2] for g in grouped_list]
    branch_nlayers = [len(layers) for layers in branch_layers]
    branch_out_pads = [layers[-1][0].shape[1] for layers in branch_layers]
    branch_max_pads = [max(w.shape[1] for (w, _) in layers) for layers in branch_layers]
    slab_width = sum(branch_out_pads)
    cbev_pad = _round_up(bev_feats.shape[1], LANE) if have_bev else 0
    out_pad = fusion_bias.shape[1]
    k_total = cbev_pad + slab_width

    # ---- constant operand VMEM (weights/biases/wf), double-buffered by pipeline --
    # NOTE: these could use pipeline_mode=pl.Buffered(1) (constant index_maps);
    # they are tiny, so the second buffer is left in place for compile robustness.
    const_bytes = wf_stacked.size * wf_stacked.dtype.itemsize + fusion_bias.size * 4
    for layers in branch_layers:
        for (w, bias) in layers:
            const_bytes += w.size * w.dtype.itemsize + bias.size * 4
    const_bytes *= 2

    # ---- per-keypoint-row VMEM bytes, with lane padding accounted ---------------
    row_bytes = 0
    if have_bev:
        row_bytes += 2 * cbev_pad * 2                       # bf16 bev, x2 buffers
    inter = 0
    for s, cin, mpad in zip(branch_nsamples, branch_cins, branch_max_pads):
        row_bytes += 2 * s * _round_up(cin, LANE) * 2       # grouped bf16, lane-padded, x2
        inter = max(inter, 2 * s * mpad * 4)                # live f32 MLP activations
    row_bytes += inter
    row_bytes += 2 * slab_width * 4 + 2 * out_pad * 4       # double-buffered f32 outputs
    row_bytes += k_total * 2 + out_pad * 4                  # stacked bf16 + fusion acc f32

    capacity = _vmem_capacity_bytes()
    budget = int(0.6 * capacity)                            # headroom for Mosaic scratch
    avail = max(budget - const_bytes, 16 * row_bytes)
    tile_m = max(16, min(max_tile_m, (avail // row_bytes) // 16 * 16))
    tile_m = min(tile_m, _round_up(max((M + 1) // 2, 16), 16))   # keep >= 2 grid steps
    n_steps = -(-M // tile_m)
    n_steps = _round_up(max(n_steps, 2), 2)                 # even step count: 2 TCs (v7x)
    m_pad = n_steps * tile_m
    vmem_limit = int(min(capacity - (2 << 20),
                         max(2 * (const_bytes + tile_m * row_bytes) + (8 << 20),
                             48 << 20)))

    args, in_specs = [], []
    flops = 0
    bytes_accessed = const_bytes // 2

    if have_bev:
        cbev = bev_feats.shape[1]
        bev = jnp.pad(bev_feats.astype(MM_DTYPE),
                      ((0, m_pad - M), (0, cbev_pad - cbev)))
        args.append(bev)
        in_specs.append(pl.BlockSpec((tile_m, cbev_pad), lambda i: (i, 0)))
        bytes_accessed += bev.size * 2

    for g in grouped_list:
        s, cin = g.shape[1], g.shape[2]
        gp = jnp.transpose(g.astype(MM_DTYPE), (1, 0, 2))   # (s, M, cin), bf16 host-side
        gp = jnp.pad(gp, ((0, 0), (0, m_pad - M), (0, 0)))
        args.append(gp)
        in_specs.append(pl.BlockSpec((s, tile_m, cin), lambda i: (0, i, 0)))
        bytes_accessed += gp.size * 2

    # Constant index_maps keep the (small) weight tiles VMEM-resident.
    for b, layers in enumerate(branch_layers):
        s = branch_nsamples[b]
        for (w, bias) in layers:
            args.append(w)
            in_specs.append(pl.BlockSpec(w.shape, lambda i: (0, 0)))
            args.append(bias)
            in_specs.append(pl.BlockSpec(bias.shape, lambda i: (0, 0)))
            flops += 2 * m_pad * s * w.shape[0] * w.shape[1]

    args.append(wf_stacked)
    in_specs.append(pl.BlockSpec(wf_stacked.shape, lambda i: (0, 0)))
    flops += 2 * m_pad * k_total * out_pad
    args.append(fusion_bias)
    in_specs.append(pl.BlockSpec(fusion_bias.shape, lambda i: (0, 0)))

    out_shape = (jax.ShapeDtypeStruct((m_pad, slab_width), jnp.float32),
                 jax.ShapeDtypeStruct((m_pad, out_pad), jnp.float32))
    out_specs = (pl.BlockSpec((tile_m, slab_width), lambda i: (i, 0)),
                 pl.BlockSpec((tile_m, out_pad), lambda i: (i, 0)))
    bytes_accessed += m_pad * (slab_width + out_pad) * 4

    kernel = _make_vsa_fused_kernel(n_branches, have_bev, branch_nsamples,
                                    branch_nlayers, branch_out_pads, tile_m)
    slab, fusion = pl.pallas_call(
        kernel,
        out_shape=out_shape,
        grid=(n_steps,),
        in_specs=in_specs,
        out_specs=out_specs,
        compiler_params=pltpu.CompilerParams(
            dimension_semantics=("parallel",),
            vmem_limit_bytes=vmem_limit),
        cost_estimate=pl.CostEstimate(flops=int(flops), transcendentals=0,
                                      bytes_accessed=int(bytes_accessed)),
    )(*args)

    # Compact (reference-layout) point features: slice branch slots from the slab.
    # TODO(synk): downstream consumers could read the 128-aligned slab directly
    # (lane-dense) and skip this small XLA concat entirely.
    pieces = []
    if have_bev:
        pieces.append(bev_feats)
    col = 0
    for b in range(n_branches):
        pieces.append(slab[:M, col:col + branch_couts[b]])
        col += branch_out_pads[b]
    point_features = jnp.concatenate(pieces, axis=1)        # (M, gathered)
    return point_features, fusion[:M, :out_channels]


# ----------------------------------------------------------------------------
# Plain-JAX glue (data-dependent gathers / sequential algorithms)
# ----------------------------------------------------------------------------
def furthest_point_sample(xyz, num_samples):
    # TODO(synk): FPS is inherently sequential; kept in JAX (lax.fori_loop).
    N = xyz.shape[0]

    def body(i, state):
        idxs, dists = state
        last_pt = xyz[idxs[i - 1]]
        d = jnp.sum((xyz - last_pt) ** 2, axis=-1)
        dists = jnp.minimum(dists, d)
        nxt = jnp.argmax(dists).astype(jnp.int32)
        return idxs.at[i].set(nxt), dists

    idxs0 = jnp.zeros((num_samples,), jnp.int32)
    dists0 = jnp.full((N,), 1e10, jnp.float32)
    idxs, _ = jax.lax.fori_loop(1, num_samples, body, (idxs0, dists0))
    return idxs


def ball_query_and_group(xyz, xyz_bid, new_xyz, new_bid, features, radius,
                         nsample, use_xyz=True):
    """Batch-aware ball query + grouping (matches stack QueryAndGroup)."""
    # TODO(synk): at production sizes (M~4k keypoints, N~100k points) this (M,N)
    # distance matrix + sort dominates wall-clock and should become a tiled
    # Pallas kernel (running per-keypoint counter); acceptable at demo sizes.
    N = xyz.shape[0]
    d2 = jnp.sum((new_xyz[:, None, :] - xyz[None, :, :]) ** 2, axis=-1)  # (M,N)
    mask = (d2 < radius * radius) & (new_bid[:, None] == xyz_bid[None, :])
    cand = jnp.where(mask, jnp.arange(N, dtype=jnp.int32)[None, :], N)
    cand = jnp.sort(cand, axis=1)[:, :nsample]                           # (M,S)
    cnt = jnp.sum(mask, axis=1)
    first = cand[:, :1]
    slot = jnp.arange(nsample)[None, :]
    idx = jnp.where(slot < cnt[:, None], cand, first)                    # pad w/ first
    empty = cnt == 0
    idx = jnp.where(empty[:, None], 0, idx)

    grouped_xyz = xyz[idx] - new_xyz[:, None, :]                         # (M,S,3)
    grouped_xyz = jnp.where(empty[:, None, None], 0.0, grouped_xyz)
    if features is not None:
        gf = features[idx]                                               # (M,S,C)
        gf = jnp.where(empty[:, None, None], 0.0, gf)
        grouped = jnp.concatenate([grouped_xyz, gf], axis=-1) if use_xyz else gf
    else:
        grouped = grouped_xyz
    return grouped.astype(jnp.float32)                                   # (M,S,3+C)


# ----------------------------------------------------------------------------
# Modules
# ----------------------------------------------------------------------------
class GuidedSAModuleMSG:
    """Holds ball-query configs and folded/padded shared-MLP params.
    The MLP + max-pool + fusion compute runs inside the fused VSA Pallas kernel."""

    def __init__(self, key, in_channels, radii, nsamples, mlps, use_xyz=True,
                 pool_method="max"):
        assert len(radii) == len(nsamples) == len(mlps)
        assert pool_method == "max"
        self.radii = list(radii)
        self.nsamples = list(nsamples)
        self.use_xyz = use_xyz
        self.branch_layers, self.branch_couts = [], []
        for spec in mlps:
            cin = in_channels + (3 if use_xyz else 0)
            key, layers, cout, _ = _build_branch_mlp(key, cin, spec)
            self.branch_layers.append(layers)
            self.branch_couts.append(cout)

    def group(self, xyz, xyz_bid, new_xyz, new_bid, features):
        return [ball_query_and_group(xyz, xyz_bid, new_xyz, new_bid, features,
                                     r, s, use_xyz=self.use_xyz)
                for r, s in zip(self.radii, self.nsamples)]


class VoxelSetAbstraction:
    def __init__(self, key, num_keypoints, out_channels, voxel_size,
                 point_cloud_range, voxel_sa_configs, rawpoint_sa_config=None,
                 bev_sa_config=None, voxel_center_as_source=False,
                 voxel_center_align="half", max_tile_m=DEFAULT_MAX_TILE_M):
        assert voxel_center_align in ("half", "halfmin")
        self.num_keypoints = num_keypoints
        self.out_channels = out_channels
        self.voxel_size = voxel_size
        self.point_cloud_range = point_cloud_range
        self.voxel_center_as_source = voxel_center_as_source
        self.voxel_center_align = voxel_center_align
        self.voxel_sa_configs = voxel_sa_configs
        self.bev_sa_config = bev_sa_config
        self.max_tile_m = max_tile_m

        self.voxel_sa_layers = []
        for cfg in voxel_sa_configs:
            key, sub = jax.random.split(key)
            self.voxel_sa_layers.append(
                GuidedSAModuleMSG(sub, cfg.in_channels, cfg.pool_radius,
                                  cfg.samples, cfg.mlps))

        self.bev_sa = bev_sa_config is not None
        self.rawpoints_sa = rawpoint_sa_config is not None
        if self.rawpoints_sa:
            key, sub = jax.random.split(key)
            self.rawpoints_sa_layer = GuidedSAModuleMSG(
                sub, rawpoint_sa_config.in_channels,
                rawpoint_sa_config.pool_radius, rawpoint_sa_config.samples,
                rawpoint_sa_config.mlps)

        # Flatten branches in the fusion/concat order used by forward():
        #   [bev?] + rawpoints branches + voxel-layer branches.
        flat_layers, flat_couts = [], []
        if self.rawpoints_sa:
            flat_layers += self.rawpoints_sa_layer.branch_layers
            flat_couts += self.rawpoints_sa_layer.branch_couts
        for layer in self.voxel_sa_layers:
            flat_layers += layer.branch_layers
            flat_couts += layer.branch_couts
        self._flat_layers, self._flat_couts = flat_layers, flat_couts

        cbev = bev_sa_config.in_channels if self.bev_sa else 0
        gathered = cbev + sum(flat_couts)
        self.gathered_channels = gathered

        # Fusion Linear(no bias) + BN(eval) + ReLU: BN scale folded into W, and W
        # stacked into a SINGLE (K_total, out_pad) weight matching the kernel-side
        # lane-padded slot layout [bev_pad | branch0_pad | branch1_pad | ...] so the
        # fusion runs as one deep-K MXU dot; padded rows are zero.
        out_pad = _round_up(out_channels, LANE)
        bn_scale = (1.0 + BN_EPS) ** -0.5
        key, k = jax.random.split(key)
        wf = (jax.random.normal(k, (gathered, out_channels), jnp.float32)
              * (2.0 / gathered) ** 0.5) * bn_scale
        cbev_pad = _round_up(cbev, LANE) if self.bev_sa else 0
        branch_out_pads = [layers[-1][0].shape[1] for layers in flat_layers]
        k_total = cbev_pad + sum(branch_out_pads)
        wf_stacked = jnp.zeros((k_total, out_pad), jnp.float32)
        row_c, row_p = 0, 0
        if self.bev_sa:
            wf_stacked = wf_stacked.at[:cbev, :out_channels].set(wf[:cbev])
            row_c, row_p = cbev, cbev_pad
        for cout, cpad in zip(flat_couts, branch_out_pads):
            wf_stacked = wf_stacked.at[row_p:row_p + cout, :out_channels].set(
                wf[row_c:row_c + cout])
            row_c += cout
            row_p += cpad
        self.wf_stacked = wf_stacked.astype(MM_DTYPE)
        self.fusion_bias = jnp.zeros((1, out_pad), jnp.float32)  # beta - mean*scale = 0

    # ---- helpers --------------------------------------------------------
    def interpolate_from_bev_features(self, keypoints, bev_features, scale_factor):
        # TODO(synk): grid_sample is a bilinear gather; kept in plain JAX
        # (align_corners=True semantics to match the reference F.grid_sample call).
        B, C, H, W = bev_features.shape
        vxy = jnp.array(self.voxel_size[:2], jnp.float32)
        tl = jnp.array(self.point_cloud_range[:2], jnp.float32)
        br = jnp.array(self.point_cloud_range[3:5], jnp.float32)
        if self.voxel_center_align == "half":
            tl = tl + 0.5 * vxy * scale_factor
            br = br - 0.5 * vxy * scale_factor
        else:  # halfmin
            tl = tl + 0.5 * vxy
            br = br - vxy * (scale_factor - 0.5)
        xy = keypoints[..., :2]
        g = (xy - tl[None, None, :]) / (br - tl)[None, None, :]
        g = g * 2.0 - 1.0                                # (B,K,2), (x,y) order
        gx = (g[..., 0] + 1.0) * 0.5 * (W - 1)
        gy = (g[..., 1] + 1.0) * 0.5 * (H - 1)
        x0 = jnp.floor(gx); y0 = jnp.floor(gy)
        x1 = x0 + 1.0; y1 = y0 + 1.0
        wx1 = gx - x0; wx0 = 1.0 - wx1
        wy1 = gy - y0; wy0 = 1.0 - wy1

        def gather(bf, yy, xx):
            valid = (xx >= 0) & (xx <= W - 1) & (yy >= 0) & (yy <= H - 1)
            xi = jnp.clip(xx, 0, W - 1).astype(jnp.int32)
            yi = jnp.clip(yy, 0, H - 1).astype(jnp.int32)
            vals = bf[:, yi, xi]                          # (C, K)
            return jnp.where(valid[None, :], vals, 0.0)

        def per_batch(bf, y0b, y1b, x0b, x1b, wy0b, wy1b, wx0b, wx1b):
            v00 = gather(bf, y0b, x0b); v01 = gather(bf, y0b, x1b)
            v10 = gather(bf, y1b, x0b); v11 = gather(bf, y1b, x1b)
            out = (v00 * wy0b * wx0b + v01 * wy0b * wx1b
                   + v10 * wy1b * wx0b + v11 * wy1b * wx1b)   # (C,K)
            return out.T                                      # (K,C)

        return jax.vmap(per_batch)(bev_features, y0, y1, x0, x1,
                                   wy0, wy1, wx0, wx1)        # (B,K,C)

    def get_voxel_centers(self, coors, scale_factor):
        centers = coors[:, jnp.array([3, 2, 1])].astype(jnp.float32)
        vs = jnp.array(self.voxel_size, jnp.float32)
        pmin = jnp.array(self.point_cloud_range[:3], jnp.float32)
        centers = centers * vs * scale_factor + pmin
        if self.voxel_center_align == "half":
            centers = centers + 0.5 * vs * scale_factor
        else:
            centers = centers + 0.5 * vs
        return centers

    def get_sampled_points(self, points, coors):
        assert points is not None or coors is not None
        if self.voxel_center_as_source:
            # TODO(synk): voxel-center source needs data-dependent per-batch
            # splits (dynamic shapes); not implemented in this synthetic demo.
            raise NotImplementedError
        src_points = [p[..., :3] for p in points]
        kps = []
        for pts in src_points:
            # TODO(synk): repeat-branch for num_points < num_keypoints omitted
            # (inputs built so that N >= num_keypoints).
            idx = furthest_point_sample(pts, self.num_keypoints)
            kps.append(pts[idx])
        return jnp.stack(kps, axis=0)                      # (B, K, 3)

    # ---- forward --------------------------------------------------------
    def forward(self, voxel_encode_features, points=None, coors=None,
                bev_encode_features=None):
        keypoints = self.get_sampled_points(points, coors)  # (B,K,3)
        B, K, _ = keypoints.shape
        key_xyz = keypoints.reshape(-1, 3)
        key_bid = jnp.repeat(jnp.arange(B, dtype=jnp.int32), K)

        bev_feats = None
        if self.bev_sa:
            pbf = self.interpolate_from_bev_features(
                keypoints, bev_encode_features, self.bev_sa_config.scale_factor)
            bev_feats = pbf.reshape(B * K, -1)              # (M, Cbev)

        # Grouping (data-dependent gather) stays in plain JAX; everything that
        # touches the grouped features runs inside the fused Pallas kernel.
        grouped_list = []
        if self.rawpoints_sa:
            batch_points = jnp.concatenate(points, axis=0)
            xyz = batch_points[:, :3]
            feats = batch_points[:, 3:] if batch_points.shape[1] > 3 else None
            xyz_bid = jnp.concatenate(
                [jnp.full((p.shape[0],), b, jnp.int32)
                 for b, p in enumerate(points)])
            grouped_list += self.rawpoints_sa_layer.group(
                xyz, xyz_bid, key_xyz, key_bid, feats)
        for k_idx, layer in enumerate(self.voxel_sa_layers):
            cur_coords = voxel_encode_features[k_idx].indices
            xyz = self.get_voxel_centers(
                cur_coords, self.voxel_sa_configs[k_idx].scale_factor)
            xyz_bid = cur_coords[:, 0].astype(jnp.int32)
            grouped_list += layer.group(
                xyz, xyz_bid, key_xyz, key_bid,
                voxel_encode_features[k_idx].features)

        point_features, fusion = vsa_fused_forward(
            bev_feats, grouped_list, self._flat_layers, self._flat_couts,
            self.wf_stacked, self.fusion_bias, self.out_channels,
            max_tile_m=self.max_tile_m)

        bid = (jnp.arange(B * K) // K).astype(key_xyz.dtype)
        key_bxyz = jnp.concatenate([bid[:, None], key_xyz], axis=-1)
        return dict(keypoint_features=point_features,
                    fusion_keypoint_features=fusion,
                    keypoints=key_bxyz)


# ----------------------------------------------------------------------------
# Demo
# ----------------------------------------------------------------------------
if __name__ == "__main__":
    key = jax.random.PRNGKey(0)
    B, K, N = 2, 32, 64
    voxel_size = [0.1, 0.1, 0.2]
    pc_range = [0.0, -1.6, -1.0, 3.2, 1.6, 1.0]
    gz, gy, gx = 10, 32, 32
    Nv = 48

    keys = jax.random.split(key, 8)
    lo = jnp.array(pc_range[:3], jnp.float32)
    hi = jnp.array(pc_range[3:], jnp.float32)

    points = []
    for b in range(B):
        xyz = jax.random.uniform(keys[b], (N, 3)) * (hi - lo) + lo
        feat = jax.random.uniform(keys[2 + b], (N, 1))
        points.append(jnp.concatenate([xyz, feat], axis=1).astype(jnp.float32))

    coords = []
    for b in range(B):
        zyx = jax.random.randint(keys[4 + b], (Nv, 3), 0,
                                 jnp.array([gz, gy, gx]))
        coords.append(jnp.concatenate(
            [jnp.full((Nv, 1), b, jnp.int32), zyx.astype(jnp.int32)], axis=1))
    coords = jnp.concatenate(coords, axis=0)                       # (2*Nv, 4)
    vfeat = jax.random.normal(keys[6], (coords.shape[0], 4), jnp.float32)
    voxel_encode_features = [types.SimpleNamespace(indices=coords,
                                                   features=vfeat)]
    bev = jax.random.normal(keys[7], (B, 4, gy, gx), jnp.float32)  # NCHW

    voxel_sa_configs = [types.SimpleNamespace(
        in_channels=4, pool_radius=[1.6], samples=[8], mlps=[[16, 16]],
        scale_factor=1)]
    rawpoint_sa_config = types.SimpleNamespace(
        in_channels=1, pool_radius=[1.0], samples=[8], mlps=[[8, 8]])
    bev_sa_config = types.SimpleNamespace(in_channels=4, scale_factor=1)

    vsa = VoxelSetAbstraction(
        jax.random.PRNGKey(42), num_keypoints=K, out_channels=32,
        voxel_size=voxel_size, point_cloud_range=pc_range,
        voxel_sa_configs=voxel_sa_configs,
        rawpoint_sa_config=rawpoint_sa_config,
        bev_sa_config=bev_sa_config)

    out = vsa.forward(voxel_encode_features, points=points, coors=None,
                      bev_encode_features=bev)
    jax.block_until_ready(out["fusion_keypoint_features"])

    assert out["keypoint_features"].shape == (B * K, vsa.gathered_channels)
    assert out["fusion_keypoint_features"].shape == (B * K, 32)
    assert out["keypoints"].shape == (B * K, 4)
    print("KERNEL_OK")
</pallas_src>

<mosaic_0001>
module attributes {stable_mosaic.version = 11 : i64} {
  func.func @kernel(%arg0: i32, %arg1: memref<32x128xbf16, #tpu.memory_space<vmem>>, %arg2: memref<8x32x4xbf16, #tpu.memory_space<vmem>>, %arg3: memref<8x32x7xbf16, #tpu.memory_space<vmem>>, %arg4: memref<4x128xbf16, #tpu.memory_space<vmem>>, %arg5: memref<1x128xf32, #tpu.memory_space<vmem>>, %arg6: memref<128x128xbf16, #tpu.memory_space<vmem>>, %arg7: memref<1x128xf32, #tpu.memory_space<vmem>>, %arg8: memref<7x128xbf16, #tpu.memory_space<vmem>>, %arg9: memref<1x128xf32, #tpu.memory_space<vmem>>, %arg10: memref<128x128xbf16, #tpu.memory_space<vmem>>, %arg11: memref<1x128xf32, #tpu.memory_space<vmem>>, %arg12: memref<384x128xbf16, #tpu.memory_space<vmem>>, %arg13: memref<1x128xf32, #tpu.memory_space<vmem>>, %arg14: memref<32x256xf32, #tpu.memory_space<vmem>>, %arg15: memref<32x128xf32, #tpu.memory_space<vmem>>) attributes {dimension_semantics = [#tpu.dimension_semantics<parallel>], iteration_bounds = array<i64: 2>, scalar_prefetch = 0 : i64, scratch_operands = 0 : i64, tpu.core_type = #tpu.core_type<tc>, window_params = [{transform_indices = @transform_0, window_bounds = array<i64: 32, 128>}, {transform_indices = @transform_1, window_bounds = array<i64: 8, 32, 4>}, {transform_indices = @transform_2, window_bounds = array<i64: 8, 32, 7>}, {pipeline_mode = #tpu.pipeline_mode<synchronous>, transform_indices = @transform_3, window_bounds = array<i64: 4, 128>}, {pipeline_mode = #tpu.pipeline_mode<synchronous>, transform_indices = @transform_4, window_bounds = array<i64: 1, 128>}, {pipeline_mode = #tpu.pipeline_mode<synchronous>, transform_indices = @transform_5, window_bounds = array<i64: 128, 128>}, {pipeline_mode = #tpu.pipeline_mode<synchronous>, transform_indices = @transform_6, window_bounds = array<i64: 1, 128>}, {pipeline_mode = #tpu.pipeline_mode<synchronous>, transform_indices = @transform_7, window_bounds = array<i64: 7, 128>}, {pipeline_mode = #tpu.pipeline_mode<synchronous>, transform_indices = @transform_8, window_bounds = array<i64: 1, 128>}, {pipeline_mode = #tpu.pipeline_mode<synchronous>, transform_indices = @transform_9, window_bounds = array<i64: 128, 128>}, {pipeline_mode = #tpu.pipeline_mode<synchronous>, transform_indices = @transform_10, window_bounds = array<i64: 1, 128>}, {pipeline_mode = #tpu.pipeline_mode<synchronous>, transform_indices = @transform_11, window_bounds = array<i64: 384, 128>}, {pipeline_mode = #tpu.pipeline_mode<synchronous>, transform_indices = @transform_12, window_bounds = array<i64: 1, 128>}, {transform_indices = @transform_13, window_bounds = array<i64: 32, 256>}, {transform_indices = @transform_14, window_bounds = array<i64: 32, 128>}]} {
    %c0 = arith.constant 0 : index
    %c0_0 = arith.constant 0 : index
    %0 = vector.load %arg1[%c0, %c0_0] : memref<32x128xbf16, #tpu.memory_space<vmem>>, vector<32x128xbf16>
    %c0_1 = arith.constant 0 : index
    %c0_2 = arith.constant 0 : index
    %c0_3 = arith.constant 0 : index
    %1 = vector.load %arg2[%c0_1, %c0_2, %c0_3] : memref<8x32x4xbf16, #tpu.memory_space<vmem>>, vector<8x32x4xbf16>
    %2 = vector.shape_cast %1 : vector<8x32x4xbf16> to vector<256x4xbf16>
    %c0_4 = arith.constant 0 : index
    %c0_5 = arith.constant 0 : index
    %3 = vector.load %arg4[%c0_4, %c0_5] : memref<4x128xbf16, #tpu.memory_space<vmem>>, vector<4x128xbf16>
    %c0_6 = arith.constant 0 : index
    %c0_7 = arith.constant 0 : index
    %4 = vector.load %arg5[%c0_6, %c0_7] : memref<1x128xf32, #tpu.memory_space<vmem>>, vector<1x128xf32>
    %cst = arith.constant dense<0.000000e+00> : vector<256x128xf32>
    %5 = tpu.matmul %2, %3, %cst {dimension_numbers = #tpu.dot_dimension_numbers<[1], [0], [0], [1], [0, 0, 1, 1], [], []>} : vector<256x4xbf16>, vector<4x128xbf16>, vector<256x128xf32> -> vector<256x128xf32>
    %6 = vector.broadcast %4 : vector<1x128xf32> to vector<256x128xf32>
    %7 = arith.addf %5, %6 : vector<256x128xf32>
    %cst_8 = arith.constant 0.000000e+00 : f32
    %8 = vector.broadcast %cst_8 : f32 to vector<256x128xf32>
    %9 = arith.maximumf %7, %8 : vector<256x128xf32>
    %c0_9 = arith.constant 0 : index
    %c0_10 = arith.constant 0 : index
    %10 = vector.load %arg6[%c0_9, %c0_10] : memref<128x128xbf16, #tpu.memory_space<vmem>>, vector<128x128xbf16>
    %c0_11 = arith.constant 0 : index
    %c0_12 = arith.constant 0 : index
    %11 = vector.load %arg7[%c0_11, %c0_12] : memref<1x128xf32, #tpu.memory_space<vmem>>, vector<1x128xf32>
    %12 = arith.truncf %9 : vector<256x128xf32> to vector<256x128xbf16>
    %cst_13 = arith.constant dense<0.000000e+00> : vector<256x128xf32>
    %13 = tpu.matmul %12, %10, %cst_13 {dimension_numbers = #tpu.dot_dimension_numbers<[1], [0], [0], [1], [0, 0, 1, 1], [], []>} : vector<256x128xbf16>, vector<128x128xbf16>, vector<256x128xf32> -> vector<256x128xf32>
    %14 = vector.broadcast %11 : vector<1x128xf32> to vector<256x128xf32>
    %15 = arith.addf %13, %14 : vector<256x128xf32>
    %cst_14 = arith.constant 0.000000e+00 : f32
    %16 = vector.broadcast %cst_14 : f32 to vector<256x128xf32>
    %17 = arith.maximumf %15, %16 : vector<256x128xf32>
    %18 = vector.extract_strided_slice %17 {offsets = [0, 0], sizes = [32, 128], strides = [1, 1]} : vector<256x128xf32> to vector<32x128xf32>
    %19 = vector.extract_strided_slice %17 {offsets = [32, 0], sizes = [32, 128], strides = [1, 1]} : vector<256x128xf32> to vector<32x128xf32>
    %20 = arith.maximumf %18, %19 : vector<32x128xf32>
    %21 = vector.extract_strided_slice %17 {offsets = [64, 0], sizes = [32, 128], strides = [1, 1]} : vector<256x128xf32> to vector<32x128xf32>
    %22 = arith.maximumf %20, %21 : vector<32x128xf32>
    %23 = vector.extract_strided_slice %17 {offsets = [96, 0], sizes = [32, 128], strides = [1, 1]} : vector<256x128xf32> to vector<32x128xf32>
    %24 = arith.maximumf %22, %23 : vector<32x128xf32>
    %25 = vector.extract_strided_slice %17 {offsets = [128, 0], sizes = [32, 128], strides = [1, 1]} : vector<256x128xf32> to vector<32x128xf32>
    %26 = arith.maximumf %24, %25 : vector<32x128xf32>
    %27 = vector.extract_strided_slice %17 {offsets = [160, 0], sizes = [32, 128], strides = [1, 1]} : vector<256x128xf32> to vector<32x128xf32>
    %28 = arith.maximumf %26, %27 : vector<32x128xf32>
    %29 = vector.extract_strided_slice %17 {offsets = [192, 0], sizes = [32, 128], strides = [1, 1]} : vector<256x128xf32> to vector<32x128xf32>
    %30 = arith.maximumf %28, %29 : vector<32x128xf32>
    %31 = vector.extract_strided_slice %17 {offsets = [224, 0], sizes = [32, 128], strides = [1, 1]} : vector<256x128xf32> to vector<32x128xf32>
    %32 = arith.maximumf %30, %31 : vector<32x128xf32>
    %c0_15 = arith.constant 0 : index
    %c0_16 = arith.constant 0 : index
    %33 = vector.load %arg14[%c0_15, %c0_16] : memref<32x256xf32, #tpu.memory_space<vmem>>, vector<32x128xf32>
    tpu.vector_store %arg14[%c0_15, %c0_16], %32 {strides = array<i32>} : memref<32x256xf32, #tpu.memory_space<vmem>>, vector<32x128xf32>,
    %34 = arith.truncf %32 : vector<32x128xf32> to vector<32x128xbf16>
    %c0_17 = arith.constant 0 : index
    %c0_18 = arith.constant 0 : index
    %c0_19 = arith.constant 0 : index
    %35 = vector.load %arg3[%c0_17, %c0_18, %c0_19] : memref<8x32x7xbf16, #tpu.memory_space<vmem>>, vector<8x32x7xbf16>
    %36 = vector.shape_cast %35 : vector<8x32x7xbf16> to vector<256x7xbf16>
    %c0_20 = arith.constant 0 : index
    %c0_21 = arith.constant 0 : index
    %37 = vector.load %arg8[%c0_20, %c0_21] : memref<7x128xbf16, #tpu.memory_space<vmem>>, vector<7x128xbf16>
    %c0_22 = arith.constant 0 : index
    %c0_23 = arith.constant 0 : index
    %38 = vector.load %arg9[%c0_22, %c0_23] : memref<1x128xf32, #tpu.memory_space<vmem>>, vector<1x128xf32>
    %cst_24 = arith.constant dense<0.000000e+00> : vector<256x128xf32>
    %39 = tpu.matmul %36, %37, %cst_24 {dimension_numbers = #tpu.dot_dimension_numbers<[1], [0], [0], [1], [0, 0, 1, 1], [], []>} : vector<256x7xbf16>, vector<7x128xbf16>, vector<256x128xf32> -> vector<256x128xf32>
    %40 = vector.broadcast %38 : vector<1x128xf32> to vector<256x128xf32>
    %41 = arith.addf %39, %40 : vector<256x128xf32>
    %cst_25 = arith.constant 0.000000e+00 : f32
    %42 = vector.broadcast %cst_25 : f32 to vector<256x128xf32>
    %43 = arith.maximumf %41, %42 : vector<256x128xf32>
    %c0_26 = arith.constant 0 : index
    %c0_27 = arith.constant 0 : index
    %44 = vector.load %arg10[%c0_26, %c0_27] : memref<128x128xbf16, #tpu.memory_space<vmem>>, vector<128x128xbf16>
    %c0_28 = arith.constant 0 : index
    %c0_29 = arith.constant 0 : index
    %45 = vector.load %arg11[%c0_28, %c0_29] : memref<1x128xf32, #tpu.memory_space<vmem>>, vector<1x128xf32>
    %46 = arith.truncf %43 : vector<256x128xf32> to vector<256x128xbf16>
    %cst_30 = arith.constant dense<0.000000e+00> : vector<256x128xf32>
    %47 = tpu.matmul %46, %44, %cst_30 {dimension_numbers = #tpu.dot_dimension_numbers<[1], [0], [0], [1], [0, 0, 1, 1], [], []>} : vector<256x128xbf16>, vector<128x128xbf16>, vector<256x128xf32> -> vector<256x128xf32>
    %48 = vector.broadcast %45 : vector<1x128xf32> to vector<256x128xf32>
    %49 = arith.addf %47, %48 : vector<256x128xf32>
    %cst_31 = arith.constant 0.000000e+00 : f32
    %50 = vector.broadcast %cst_31 : f32 to vector<256x128xf32>
    %51 = arith.maximumf %49, %50 : vector<256x128xf32>
    %52 = vector.extract_strided_slice %51 {offsets = [0, 0], sizes = [32, 128], strides = [1, 1]} : vector<256x128xf32> to vector<32x128xf32>
    %53 = vector.extract_strided_slice %51 {offsets = [32, 0], sizes = [32, 128], strides = [1, 1]} : vector<256x128xf32> to vector<32x128xf32>
    %54 = arith.maximumf %52, %53 : vector<32x128xf32>
    %55 = vector.extract_strided_slice %51 {offsets = [64, 0], sizes = [32, 128], strides = [1, 1]} : vector<256x128xf32> to vector<32x128xf32>
    %56 = arith.maximumf %54, %55 : vector<32x128xf32>
    %57 = vector.extract_strided_slice %51 {offsets = [96, 0], sizes = [32, 128], strides = [1, 1]} : vector<256x128xf32> to vector<32x128xf32>
    %58 = arith.maximumf %56, %57 : vector<32x128xf32>
    %59 = vector.extract_strided_slice %51 {offsets = [128, 0], sizes = [32, 128], strides = [1, 1]} : vector<256x128xf32> to vector<32x128xf32>
    %60 = arith.maximumf %58, %59 : vector<32x128xf32>
    %61 = vector.extract_strided_slice %51 {offsets = [160, 0], sizes = [32, 128], strides = [1, 1]} : vector<256x128xf32> to vector<32x128xf32>
    %62 = arith.maximumf %60, %61 : vector<32x128xf32>
    %63 = vector.extract_strided_slice %51 {offsets = [192, 0], sizes = [32, 128], strides = [1, 1]} : vector<256x128xf32> to vector<32x128xf32>
    %64 = arith.maximumf %62, %63 : vector<32x128xf32>
    %65 = vector.extract_strided_slice %51 {offsets = [224, 0], sizes = [32, 128], strides = [1, 1]} : vector<256x128xf32> to vector<32x128xf32>
    %66 = arith.maximumf %64, %65 : vector<32x128xf32>
    %c0_32 = arith.constant 0 : index
    %c128 = arith.constant 128 : index
    %67 = vector.load %arg14[%c0_32, %c128] : memref<32x256xf32, #tpu.memory_space<vmem>>, vector<32x128xf32>
    tpu.vector_store %arg14[%c0_32, %c128], %66 {strides = array<i32>} : memref<32x256xf32, #tpu.memory_space<vmem>>, vector<32x128xf32>,
    %68 = arith.truncf %66 : vector<32x128xf32> to vector<32x128xbf16>
    %69 = tpu.concatenate %0, %34, %68 in 1 : vector<32x128xbf16>, vector<32x128xbf16>, vector<32x128xbf16> -> vector<32x384xbf16>
    %c0_33 = arith.constant 0 : index
    %c0_34 = arith.constant 0 : index
    %70 = vector.load %arg12[%c0_33, %c0_34] : memref<384x128xbf16, #tpu.memory_space<vmem>>, vector<384x128xbf16>
    %cst_35 = arith.constant dense<0.000000e+00> : vector<32x128xf32>
    %71 = tpu.matmul %69, %70, %cst_35 {dimension_numbers = #tpu.dot_dimension_numbers<[1], [0], [0], [1], [0, 0, 1, 1], [], []>} : vector<32x384xbf16>, vector<384x128xbf16>, vector<32x128xf32> -> vector<32x128xf32>
    %c0_36 = arith.constant 0 : index
    %c0_37 = arith.constant 0 : index
    %72 = vector.load %arg13[%c0_36, %c0_37] : memref<1x128xf32, #tpu.memory_space<vmem>>, vector<1x128xf32>
    %73 = vector.broadcast %72 : vector<1x128xf32> to vector<32x128xf32>
    %74 = arith.addf %71, %73 : vector<32x128xf32>
    %cst_38 = arith.constant 0.000000e+00 : f32
    %75 = vector.broadcast %cst_38 : f32 to vector<32x128xf32>
    %76 = arith.maximumf %74, %75 : vector<32x128xf32>
    %c0_39 = arith.constant 0 : index
    %c0_40 = arith.constant 0 : index
    %77 = vector.load %arg15[%c0_39, %c0_40] : memref<32x128xf32, #tpu.memory_space<vmem>>, vector<32x128xf32>
    tpu.vector_store %arg15[%c0_39, %c0_40], %76 {strides = array<i32>} : memref<32x128xf32, #tpu.memory_space<vmem>>, vector<32x128xf32>,
    return
  }
  func.func @transform_0(%arg0: i32) -> (i32, i32) {
    %c0_i32 = arith.constant 0 : i32
    %c0_i32_0 = arith.constant 0 : i32
    return %arg0, %c0_i32 : i32, i32
  }
  func.func @transform_1(%arg0: i32) -> (i32, i32, i32) {
    %c0_i32 = arith.constant 0 : i32
    %c0_i32_0 = arith.constant 0 : i32
    %c0_i32_1 = arith.constant 0 : i32
    return %c0_i32, %arg0, %c0_i32_0 : i32, i32, i32
  }
  func.func @transform_2(%arg0: i32) -> (i32, i32, i32) {
    %c0_i32 = arith.constant 0 : i32
    %c0_i32_0 = arith.constant 0 : i32
    %c0_i32_1 = arith.constant 0 : i32
    return %c0_i32, %arg0, %c0_i32_0 : i32, i32, i32
  }
  func.func @transform_3(%arg0: i32) -> (i32, i32) {
    %c0_i32 = arith.constant 0 : i32
    %c0_i32_0 = arith.constant 0 : i32
    %c0_i32_1 = arith.constant 0 : i32
    return %c0_i32, %c0_i32_0 : i32, i32
  }
  func.func @transform_4(%arg0: i32) -> (i32, i32) {
    %c0_i32 = arith.constant 0 : i32
    %c0_i32_0 = arith.constant 0 : i32
    %c0_i32_1 = arith.constant 0 : i32
    return %c0_i32, %c0_i32_0 : i32, i32
  }
  func.func @transform_5(%arg0: i32) -> (i32, i32) {
    %c0_i32 = arith.constant 0 : i32
    %c0_i32_0 = arith.constant 0 : i32
    %c0_i32_1 = arith.constant 0 : i32
    return %c0_i32, %c0_i32_0 : i32, i32
  }
  func.func @transform_6(%arg0: i32) -> (i32, i32) {
    %c0_i32 = arith.constant 0 : i32
    %c0_i32_0 = arith.constant 0 : i32
    %c0_i32_1 = arith.constant 0 : i32
    return %c0_i32, %c0_i32_0 : i32, i32
  }
  func.func @transform_7(%arg0: i32) -> (i32, i32) {
    %c0_i32 = arith.constant 0 : i32
    %c0_i32_0 = arith.constant 0 : i32
    %c0_i32_1 = arith.constant 0 : i32
    return %c0_i32, %c0_i32_0 : i32, i32
  }
  func.func @transform_8(%arg0: i32) -> (i32, i32) {
    %c0_i32 = arith.constant 0 : i32
    %c0_i32_0 = arith.constant 0 : i32
    %c0_i32_1 = arith.constant 0 : i32
    return %c0_i32, %c0_i32_0 : i32, i32
  }
  func.func @transform_9(%arg0: i32) -> (i32, i32) {
    %c0_i32 = arith.constant 0 : i32
    %c0_i32_0 = arith.constant 0 : i32
    %c0_i32_1 = arith.constant 0 : i32
    return %c0_i32, %c0_i32_0 : i32, i32
  }
  func.func @transform_10(%arg0: i32) -> (i32, i32) {
    %c0_i32 = arith.constant 0 : i32
    %c0_i32_0 = arith.constant 0 : i32
    %c0_i32_1 = arith.constant 0 : i32
    return %c0_i32, %c0_i32_0 : i32, i32
  }
  func.func @transform_11(%arg0: i32) -> (i32, i32) {
    %c0_i32 = arith.constant 0 : i32
    %c0_i32_0 = arith.constant 0 : i32
    %c0_i32_1 = arith.constant 0 : i32
    return %c0_i32, %c0_i32_0 : i32, i32
  }
  func.func @transform_12(%arg0: i32) -> (i32, i32) {
    %c0_i32 = arith.constant 0 : i32
    %c0_i32_0 = arith.constant 0 : i32
    %c0_i32_1 = arith.constant 0 : i32
    return %c0_i32, %c0_i32_0 : i32, i32
  }
  func.func @transform_13(%arg0: i32) -> (i32, i32) {
    %c0_i32 = arith.constant 0 : i32
    %c0_i32_0 = arith.constant 0 : i32
    return %arg0, %c0_i32 : i32, i32
  }
  func.func @transform_14(%arg0: i32) -> (i32, i32) {
    %c0_i32 = arith.constant 0 : i32
    %c0_i32_0 = arith.constant 0 : i32
    return %arg0, %c0_i32 : i32, i32
  }
}

</mosaic_0001>

<bundles_post_ra>
// kernel: tpu_custom_call.1
= control target key start
LH: loop header
LB: loop body
LE: loop exit
PB: predicated region body
PF: predicated region fallthrough
CT: control target
= control target key end

     0   :  { %s4037_s0 = inlined_call_operand.vmem [shape: bf16[64,128], index: 0, kind: input, shape index: {}]   ;;  %s4038_s1 = inlined_call_operand.vmem [shape: bf16[8,64,4], index: 1, kind: input, shape index: {}]   ;;  %s4039_s2 = inlined_call_operand.vmem [shape: bf16[8,64,7], index: 2, kind: input, shape index: {}]   ;;  %s4040_s3 = inlined_call_operand.vmem [shape: bf16[4,128], index: 3, kind: input, shape index: {}]   ;;  %s4041_s4 = inlined_call_operand.vmem [shape: f32[1,128], index: 4, kind: input, shape index: {}]   ;;  %s4042_s5 = inlined_call_operand.vmem [shape: bf16[128,128], index: 5, kind: input, shape index: {}]   ;;  %s4043_s6 = inlined_call_operand.vmem [shape: f32[1,128], index: 6, kind: input, shape index: {}]   ;;  %s4044_s7 = inlined_call_operand.vmem [shape: bf16[7,128], index: 7, kind: input, shape index: {}]   ;;  %s4045_s8 = inlined_call_operand.vmem [shape: f32[1,128], index: 8, kind: input, shape index: {}]   ;;  %s4046_s9 = inlined_call_operand.vmem [shape: bf16[128,128], index: 9, kind: input, shape index: {}]   ;;  %s4047_s10 = inlined_call_operand.vmem [shape: f32[1,128], index: 10, kind: input, shape index: {}]   ;;  %s4048_s11 = inlined_call_operand.vmem [shape: bf16[384,128], index: 11, kind: input, shape index: {}]   ;;  %s4049_s12 = inlined_call_operand.vmem [shape: f32[1,128], index: 12, kind: input, shape index: {}]   ;;  %s4050_s13 = inlined_call_operand.hbm [shape: f32[64,256], index: 13, kind: output, shape index: {0}]   ;;  %s4051_s14 = inlined_call_operand.hbm [shape: f32[64,128], index: 14, kind: output, shape index: {1}]  }
   0x1   :  { %4052 = sst [smem:[#allocation11_spill]] %s4038_s1 }
   0x2   :  { %4053 = sst [smem:[#allocation12_spill]] %s4039_s2 }
   0x3   :  { %4054 = sst [smem:[#allocation13_spill]] %s4040_s3 }
   0x4   :  { %4055 = sst [smem:[#allocation14_spill]] %s4041_s4 }
   0x5   :  { %20 = vsyncpa [#allocation5], 0 }
   0x6   :  { %22 = vsyncpa [#allocation5 + $0x1], 0 }
   0x7   :  { %23 = vsyncpa [#allocation7], 0 }
   0x8   :  { %25 = vsyncpa [#allocation7 + $0x1], 0  ;;  %s3469_s29 = smov 0   ;;  %s3471_s30 = smov 0  }
   0x9   :  { %s3473_s15 = smov 0   ;;  %s3475_s16 = smov 0  }
   0xa LB: > { %s3490_s17 = sadd.s32 4294967295, %s3385_s16   ;;  %s2706_s18 = sadd.s32 4294967294, %s3385_s16   ;;  %s3385_s16 = sphi %s3475_s16, %s4068_s16   ;;  %s3381_s15 = sphi %s3473_s15, %s4067_s15   ;;  %s3377_s30 = sphi %s3471_s30, %s4066_s30   ;;  %s3373_s29 = sphi %s3469_s29, %s4065_s29  }
   0xb   : > { %s3494_s19 = sadd.s32 1, %s3385_s16   ;;  %s64_s20 = sadd.s32 1, %s3381_s15 }
   0xc   : > { %s61_s21 = ssub.s32 %s3385_s16, %s3494_s19  ;;  %p71_p0 = scmp.ne.s32.totalorder %s3381_s15, %s3377_s30 }
   0xd   : > { %p62_p1 = scmp.eq.s32.totalorder %s61_s21, 0  ;;  %p72_p2 = scmp.eq.s32.totalorder %s3385_s16, 0 }
   0xe   : > { %p337_p3 = scmp.eq.s32.totalorder %s3490_s17, 1  ;;  %p342_p4 = scmp.ne.s32.totalorder %s3377_s30, %s3373_s29 }
   0xf   : > { %s3506_s22 = scalar_select %p62_p1, %s3381_s15, %s64_s20  }
  0x10   : > { %p3508_p5 = por %p72_p2, %p71_p0  ;;  %p3512_p6 = por %p337_p3, %p71_p0 }
  0x11   : > { %4056 = sst [smem:[#allocation10_spill]] %s3506_s22  ;;  %p343_p7 = scmp.eq.s32.totalorder %s2706_s18, 1 }
  0x12   : > { %p2708_p9 = scmp.ge.s32.totalorder %s3385_s16, 2 }
  0x13   : > { %p3516_p8 = por %p343_p7, %p342_p4 }
  0x14   : > { %415 = sbr.rel (%p2708_p9) target bundleno = 63 (0x3f), region = 56 }
  0x1b   : > { %427 = sbr.rel (!%p3508_p5) target bundleno = 45 (0x2d), region = 64  ;;  %s429_s26 = sand.u32 (%p3508_p5), 1, %s3381_s15  }
  0x1c   : > { %s2842_s27 = sshll.u32 (%p3508_p5), %s3385_s16, 4  ;;  %s2709_s28 = sshll.u32 (%p3508_p5), %s429_s26, 7 }
  0x1d   : > { %s4060_s1 = sld [smem:[#allocation11_spill]] (%p3508_p5)  ;;  %s431_s22 = scalar_lea.vmem (%p3508_p5), [#allocation2], %s2709_s28 }
  0x23   : > { %s3530_s18 = scalar_lea.vmem %s4060_s1, %s2842_s27 }
  0x24   : > { %v450_v0 = vld [vmem:[%s3530_s18] sm:$0xff]   ;;  %v454_v1 = vld [vmem:[%s3530_s18 + $0x8] sm:$0xff]  }
  0x25   : > { %v458_v2 = vld [vmem:[%s3530_s18 + $0x20] sm:$0xff]   ;;  %451 = vst [vmem:[%s431_s22] sm:$0xff] %v450_v0   ;;  %455 = vst [vmem:[%s431_s22 + $0x8] sm:$0xff] %v454_v1   ;;  %v462_v3 = vld [vmem:[%s3530_s18 + $0x28] sm:$0xff]  }
  0x26   : > { %459 = vst [vmem:[%s431_s22 + $0x10] sm:$0xff] %v458_v2   ;;  %v466_v4 = vld [vmem:[%s3530_s18 + $0x40] sm:$0xff]   ;;  %v470_v5 = vld [vmem:[%s3530_s18 + $0x48] sm:$0xff]   ;;  %463 = vst [vmem:[%s431_s22 + $0x18] sm:$0xff] %v462_v3  }
  0x27   : > { %467 = vst [vmem:[%s431_s22 + $0x20] sm:$0xff] %v466_v4   ;;  %471 = vst [vmem:[%s431_s22 + $0x28] sm:$0xff] %v470_v5   ;;  %v474_v6 = vld [vmem:[%s3530_s18 + $0x60] sm:$0xff]   ;;  %v478_v7 = vld [vmem:[%s3530_s18 + $0x68] sm:$0xff]  }
  0x28   : > { %v482_v8 = vld [vmem:[%s3530_s18 + $0x80] sm:$0xff]   ;;  %475 = vst [vmem:[%s431_s22 + $0x30] sm:$0xff] %v474_v6   ;;  %479 = vst [vmem:[%s431_s22 + $0x38] sm:$0xff] %v478_v7   ;;  %v486_v9 = vld [vmem:[%s3530_s18 + $0x88] sm:$0xff]  }
  0x29   : > { %483 = vst [vmem:[%s431_s22 + $0x40] sm:$0xff] %v482_v8   ;;  %v490_v10 = vld [vmem:[%s3530_s18 + $0xa0] sm:$0xff]   ;;  %v494_v11 = vld [vmem:[%s3530_s18 + $0xa8] sm:$0xff]   ;;  %487 = vst [vmem:[%s431_s22 + $0x48] sm:$0xff] %v486_v9  }
  0x2a   : > { %491 = vst [vmem:[%s431_s22 + $0x50] sm:$0xff] %v490_v10   ;;  %495 = vst [vmem:[%s431_s22 + $0x58] sm:$0xff] %v494_v11   ;;  %v498_v12 = vld [vmem:[%s3530_s18 + $0xc0] sm:$0xff]   ;;  %v502_v13 = vld [vmem:[%s3530_s18 + $0xc8] sm:$0xff]  }
  0x2b   : > { %v506_v14 = vld [vmem:[%s3530_s18 + $0xe0] sm:$0xff]   ;;  %499 = vst [vmem:[%s431_s22 + $0x60] sm:$0xff] %v498_v12   ;;  %503 = vst [vmem:[%s431_s22 + $0x68] sm:$0xff] %v502_v13   ;;  %v510_v15 = vld [vmem:[%s3530_s18 + $0xe8] sm:$0xff]  }
  0x2c   : > { %507 = vst [vmem:[%s431_s22 + $0x70] sm:$0xff] %v506_v14   ;;  %511 = vst [vmem:[%s431_s22 + $0x78] sm:$0xff] %v510_v15  }
  0x2d PF: > { %600 = sbr.rel (!%p3508_p5) target bundleno = 63 (0x3f), region = 105  ;;  %s602_s26 = sand.u32 (%p3508_p5), 1, %s3381_s15  }
  0x2e   : > { %s2843_s27 = sshll.u32 (%p3508_p5), %s3385_s16, 4  ;;  %s2712_s28 = sshll.u32 (%p3508_p5), %s602_s26, 7 }
  0x2f   : > { %s4061_s2 = sld [smem:[#allocation12_spill]] (%p3508_p5)  ;;  %s604_s22 = scalar_lea.vmem (%p3508_p5), [#allocation3], %s2712_s28 }
  0x35   : > { %s3555_s1 = scalar_lea.vmem %s4061_s2, %s2843_s27 }
  0x36   : > { %v623_v16 = vld [vmem:[%s3555_s1] sm:$0xff]   ;;  %v627_v17 = vld [vmem:[%s3555_s1 + $0x8] sm:$0xff]  }
  0x37   : > { %v631_v18 = vld [vmem:[%s3555_s1 + $0x20] sm:$0xff]   ;;  %624 = vst [vmem:[%s604_s22] sm:$0xff] %v623_v16   ;;  %628 = vst [vmem:[%s604_s22 + $0x8] sm:$0xff] %v627_v17   ;;  %v635_v19 = vld [vmem:[%s3555_s1 + $0x28] sm:$0xff]  }
  0x38   : > { %632 = vst [vmem:[%s604_s22 + $0x10] sm:$0xff] %v631_v18   ;;  %v639_v20 = vld [vmem:[%s3555_s1 + $0x40] sm:$0xff]   ;;  %v643_v21 = vld [vmem:[%s3555_s1 + $0x48] sm:$0xff]   ;;  %636 = vst [vmem:[%s604_s22 + $0x18] sm:$0xff] %v635_v19  }
  0x39   : > { %640 = vst [vmem:[%s604_s22 + $0x20] sm:$0xff] %v639_v20   ;;  %644 = vst [vmem:[%s604_s22 + $0x28] sm:$0xff] %v643_v21   ;;  %v647_v22 = vld [vmem:[%s3555_s1 + $0x60] sm:$0xff]   ;;  %v651_v23 = vld [vmem:[%s3555_s1 + $0x68] sm:$0xff]  }
  0x3a   : > { %v655_v24 = vld [vmem:[%s3555_s1 + $0x80] sm:$0xff]   ;;  %648 = vst [vmem:[%s604_s22 + $0x30] sm:$0xff] %v647_v22   ;;  %652 = vst [vmem:[%s604_s22 + $0x38] sm:$0xff] %v651_v23   ;;  %v659_v25 = vld [vmem:[%s3555_s1 + $0x88] sm:$0xff]  }
  0x3b   : > { %656 = vst [vmem:[%s604_s22 + $0x40] sm:$0xff] %v655_v24   ;;  %v663_v26 = vld [vmem:[%s3555_s1 + $0xa0] sm:$0xff]   ;;  %v667_v27 = vld [vmem:[%s3555_s1 + $0xa8] sm:$0xff]   ;;  %660 = vst [vmem:[%s604_s22 + $0x48] sm:$0xff] %v659_v25  }
  0x3c   : > { %664 = vst [vmem:[%s604_s22 + $0x50] sm:$0xff] %v663_v26   ;;  %668 = vst [vmem:[%s604_s22 + $0x58] sm:$0xff] %v667_v27   ;;  %v671_v28 = vld [vmem:[%s3555_s1 + $0xc0] sm:$0xff]   ;;  %v675_v29 = vld [vmem:[%s3555_s1 + $0xc8] sm:$0xff]  }
  0x3d   : > { %v679_v30 = vld [vmem:[%s3555_s1 + $0xe0] sm:$0xff]   ;;  %672 = vst [vmem:[%s604_s22 + $0x60] sm:$0xff] %v671_v28   ;;  %676 = vst [vmem:[%s604_s22 + $0x68] sm:$0xff] %v675_v29   ;;  %v683_v31 = vld [vmem:[%s3555_s1 + $0xe8] sm:$0xff]  }
  0x3e   : > { %680 = vst [vmem:[%s604_s22 + $0x70] sm:$0xff] %v679_v30   ;;  %684 = vst [vmem:[%s604_s22 + $0x78] sm:$0xff] %v683_v31  }
  0x3f PF: > { %p2715_p10 = scmp.ge.s32.totalorder %s3385_s16, 1  ;;  %p772_p11 = scmp.lt.s32.totalorder %s3385_s16, 3 }
  0x41   : > { %p773_p12 = pnand %p2715_p10, %p772_p11 }
  0x42   : > { %s4062_s3 = sld [smem:[#allocation13_spill]] (!%p773_p12)  ;;  %vm1029_vm0 = vcmask (!%p773_p12), 1041408   ;;  %s3579_s26 = sand.u32 (!%p773_p12), 1, %s3377_s30   ;;  %v3233_v33 = vld [vmem:[%s4042_s5] sm:$0xff] (!%p773_p12)   ;;  %vm980_vm1 = vcmask (!%p773_p12), 31744   ;;  %v3234_v42 = vld [vmem:[%s4042_s5 + $0x8] sm:$0xff] (!%p773_p12)  }
  0x43   : > { %776 = sbr.rel (%p773_p12) target bundleno = 1043 (0x413), region = 146  ;;  %s2716_s1 = sshll.u32 (!%p773_p12), %s3579_s26, 7  ;;  %3151 = vmatprep.subr.bf16.mxu1 (!%p773_p12), %v3233_v33  ;;  %v3235_v43 = vld [vmem:[%s4042_s5 + $0x10] sm:$0xff] (!%p773_p12)   ;;  %v3236_v45 = vld [vmem:[%s4042_s5 + $0x18] sm:$0xff] (!%p773_p12)   ;;  %v3237_v47 = vld [vmem:[%s4042_s5 + $0x20] sm:$0xff] (!%p773_p12)   ;;  %vm1709_vm2 = vcmask (!%p773_p12), 1042432  }
  0x44   : > { %s3587_s20 = scalar_lea.vmem (!%p773_p12), [#allocation2], %s2716_s1  ;;  %3159 = vmatpush3.bf16.msra.mxu1 (!%p773_p12), %v3233_v33  ;;  %s3616_s21 = scalar_lea.vmem (!%p773_p12), [#allocation3], %s2716_s1  ;;  %v3238_v48 = vld [vmem:[%s4042_s5 + $0x28] sm:$0xff] (!%p773_p12)   ;;  %v3239_v51 = vld [vmem:[%s4042_s5 + $0x30] sm:$0xff] (!%p773_p12)   ;;  %v3240_v57 = vld [vmem:[%s4042_s5 + $0x38] sm:$0xff] (!%p773_p12)   ;;  %vm1710_vm3 = vcmask (!%p773_p12), 1043456  }
  0x45   : > { %v3217_v35 = vld [vmem:[%s3587_s20] sm:$0xff] (!%p773_p12)   ;;  %v3218_v36 = vld [vmem:[%s3587_s20 + $0x8] sm:$0xff] (!%p773_p12)   ;;  %v3219_v37 = vld [vmem:[%s3587_s20 + $0x10] sm:$0xff] (!%p773_p12)   ;;  %3152 = vmatprep.subr.bf16.mxu1 (!%p773_p12), %v3234_v42  ;;  %v3387_v58 = vmov (!%p773_p12), 65535   ;;  %s4063_s4 = sld [smem:[#allocation14_spill]] (!%p773_p12)  ;;  %vm1660_vm4 = vcmask (!%p773_p12), 56320  }
  0x46   : > { %2969 = vmatprep.mubr.msk.bf16.mxu0 (!%p773_p12), %vm980_vm1, %v3217_v35  ;;  %v3220_v38 = vld [vmem:[%s3587_s20 + $0x18] sm:$0xff] (!%p773_p12)   ;;  %v3221_v39 = vld [vmem:[%s3587_s20 + $0x20] sm:$0xff] (!%p773_p12)   ;;  %v3222_v40 = vld [vmem:[%s3587_s20 + $0x28] sm:$0xff] (!%p773_p12)   ;;  %v1711_v59 = vsel (!%p773_p12), %vm1709_vm2, 4294967295, %v3387_v58 }
  0x47   : > { %v3223_v41 = vld [vmem:[%s3587_s20 + $0x30] sm:$0xff] (!%p773_p12)   ;;  %v3224_v44 = vld [vmem:[%s3587_s20 + $0x38] sm:$0xff] (!%p773_p12)   ;;  %v3225_v46 = vld [vmem:[%s3587_s20 + $0x40] sm:$0xff] (!%p773_p12)   ;;  %v1712_v61 = vsel (!%p773_p12), %vm1710_vm3, %v1711_v59, 0 }
  0x48   : > { %v892_v32 = vld [vmem:[%s4062_s3] sm:$0x3] (!%p773_p12)  ;;  %3160 = vmatpush3.bf16.msra.mxu1 (!%p773_p12), %v3234_v42  ;;  %v3226_v49 = vld [vmem:[%s3587_s20 + $0x48] sm:$0xff] (!%p773_p12)   ;;  %v3227_v50 = vld [vmem:[%s3587_s20 + $0x50] sm:$0xff] (!%p773_p12)   ;;  %s2541_s3 = scalar_lea.sflag (!%p773_p12), [#allocation5], %s3579_s26 }
  0x49   : > { %3167 = vmatprep.subr.msk.bf16.mxu0 (!%p773_p12), %vm1029_vm0, %v892_v32  ;;  %v1031_v34 = vsel (!%p773_p12), %vm1029_vm0, %v892_v32, 0  ;;  %3153 = vmatprep.subr.bf16.mxu1 (!%p773_p12), %v3235_v43  ;;  %v3228_v52 = vld [vmem:[%s3587_s20 + $0x58] sm:$0xff] (!%p773_p12)   ;;  %v3229_v53 = vld [vmem:[%s3587_s20 + $0x60] sm:$0xff] (!%p773_p12)   ;;  %v3230_v54 = vld [vmem:[%s3587_s20 + $0x68] sm:$0xff] (!%p773_p12)  }
  0x4a   : > { %2968 = vmatpush3.bf16.msra.mxu0 %v1031_v34  ;;  %v3231_v55 = vld [vmem:[%s3587_s20 + $0x70] sm:$0xff]   ;;  %v3232_v56 = vld [vmem:[%s3587_s20 + $0x78] sm:$0xff]   ;;  %v1572_v60 = vld [vmem:[%s4044_s7] sm:$0xf]  ;;  %s2720_s20 = sshll.u32 %s3490_s17, 2 }
  0x4b   : > { %3001 = vmatprep.subr.bf16.mxu0 %v3233_v33  ;;  %v1714_v62 = vand.u32 %v1712_v61, %v1572_v60  ;;  %v3257_v63 = vld [vmem:[%s4046_s9] sm:$0xff]   ;;  %v3242_v29 = vld [vmem:[%s3616_s21 + $0x8] sm:$0xff]   ;;  %v3243_v32 = vld [vmem:[%s3616_s21 + $0x10] sm:$0xff]   ;;  %p846_p13 = scmp.lt.s32.totalorder %s2720_s20, 7 }
  0x4c   : > { %3161 = vmatpush3.bf16.msra.mxu1 %v3235_v43  ;;  %v3655_v0 = vld [vmem:[%s4063_s4] ss:$0 sm:$0xff]  ;;  %v3258_v35 = vld [vmem:[%s4046_s9 + $0x8] sm:$0xff]   ;;  %s2718_s4 = sshll.u32 %s3579_s26, 6 }
  0x4d   : > { %2970 = vmatmul.mubr.msk.bf16.vlgmr.msra.gmra.mrb[0].mxu0 %vm980_vm1, %v3218_v36  ;;  %3154 = vmatprep.subr.bf16.mxu1 %v3236_v45  ;;  %v3241_v16 = vld [vmem:[%s3616_s21] sm:$0xff]   ;;  %s4070_s20 = smov (!%p846_p13, %s2720_s20), 7  ;;  %s3867_s1 = scalar_lea.vmem [#allocation4], %s2718_s4 }
  0x4e   : > { %2973 = vmatprep.mubr.msk.bf16.mxu0 %vm980_vm1, %v3219_v37  ;;  %3002 = vmatpush3.bf16.msra.mxu0 %v3233_v33  ;;  %s2560_s27 = sshll.u32 %s3867_s1, 4  ;;  %s3955_s27 = int_to_ptr.vmem [resolvable:$true] %s2560_s27 }
  0x4f   : > { %3003 = vmatprep.subr.bf16.mxu0 %v3234_v42  ;;  %s3291_s23 = scalar_lea.vmem %s3955_s27, 1024 }
  0x50   : > { %3162 = vmatpush3.bf16.msra.mxu1 %v3236_v45  ;;  %p3292_p0 = scmp.ne.s32.totalorder %s3955_s27, %s3291_s23 }
  0x51   : > { %3155 = vmatprep.subr.bf16.mxu1 %v3237_v47 }
  0x52   : > { %3004 = vmatpush3.bf16.msra.mxu0 %v3234_v42  ;;  %p3293_p1 = pnand %p3292_p0, %p3512_p6 }
  0x53   : > { %3005 = vmatprep.subr.bf16.mxu0 %v3235_v43 }
  0x54   : > { %3163 = vmatpush3.bf16.msra.mxu1 %v3237_v47  ;;  %p3294_p2 = pneg %p3293_p1 }
  0x55   : > { %2974 = vmatmul.mubr.msk.bf16.gmra.mrb[4].mxu0 %vm980_vm1, %v3220_v38  ;;  %3156 = vmatprep.subr.bf16.mxu1 %v3238_v48 }
  0x56   : > { %2977 = vmatprep.mubr.msk.bf16.mxu0 %vm980_vm1, %v3221_v39  ;;  %3006 = vmatpush3.bf16.msra.mxu0 %v3235_v43 }
  0x57   : > { %3007 = vmatprep.subr.bf16.mxu0 %v3236_v45 }
  0x58   : > { %3164 = vmatpush3.bf16.msra.mxu1 %v3238_v48 }
  0x59   : > { %3157 = vmatprep.subr.bf16.mxu1 %v3239_v51 }
  0x5a   : > { %3008 = vmatpush3.bf16.msra.mxu0 %v3236_v45 }
  0x5b   : > { %3009 = vmatprep.subr.bf16.mxu0 %v3237_v47 }
  0x5c   : > { %3165 = vmatpush3.bf16.msra.mxu1 %v3239_v51 }
  0x5d   : > { %2978 = vmatmul.mubr.msk.bf16.gmra.mrb[8].mxu0 %vm980_vm1, %v3222_v40  ;;  %3158 = vmatprep.subr.bf16.mxu1 %v3240_v57 }
  0x5e   : > { %2981 = vmatprep.mubr.msk.bf16.mxu0 %vm980_vm1, %v3223_v41  ;;  %3010 = vmatpush3.bf16.msra.mxu0 %v3237_v47  ;;  %v3244_v47 = vld [vmem:[%s3616_s21 + $0x18] sm:$0xff]  }
  0x5f   : > { %3011 = vmatprep.subr.bf16.mxu0 %v3238_v48 }
  0x60   : > { %3166 = vmatpush3.bf16.msra.mxu1 %v3240_v57 }
  0x61   : > { %3083 = vmatprep.subr.bf16.mxu1 %v3257_v63 }
  0x62   : > { %3012 = vmatpush3.bf16.msra.mxu0 %v3238_v48 }
  0x63   : > { %3013 = vmatprep.subr.bf16.mxu0 %v3239_v51 }
  0x65   : > { %2982 = vmatmul.mubr.msk.bf16.gmra.mrb[12].mxu0 %vm980_vm1, %v3224_v44  ;;  %v3259_v44 = vld [vmem:[%s4046_s9 + $0x10] sm:$0xff]  }
  0x66   : > { %2985 = vmatprep.mubr.msk.bf16.mxu0 %vm980_vm1, %v3225_v46  ;;  %3014 = vmatpush3.bf16.msra.mxu0 %v3239_v51 }
  0x67   : > { %3015 = vmatprep.subr.bf16.mxu0 %v3240_v57 }
  0x6a   : > { %3016 = vmatpush3.bf16.msra.mxu0 %v3240_v57 }
  0x6b   : > { %3049 = vmatprep.subr.bf16.mxu0 %v1714_v62 }
  0x6d   : > { %2986 = vmatmul.mubr.msk.bf16.gmra.mrb[16].mxu0 %vm980_vm1, %v3226_v49 }
  0x6e   : > { %2989 = vmatprep.mubr.msk.bf16.mxu0 %vm980_vm1, %v3227_v50  ;;  %v3245_v50 = vld [vmem:[%s3616_s21 + $0x20] sm:$0xff]  }
  0x75   : > { %2990 = vmatmul.mubr.msk.bf16.gmra.mrb[20].mxu0 %vm980_vm1, %v3228_v52 }
  0x76   : > { %2993 = vmatprep.mubr.msk.bf16.mxu0 %vm980_vm1, %v3229_v53  ;;  %v3260_v53 = vld [vmem:[%s4046_s9 + $0x18] sm:$0xff]  }
  0x7d   : > { %2994 = vmatmul.mubr.msk.bf16.gmra.mrb[24].mxu0 %vm980_vm1, %v3230_v54 }
  0x7e   : > { %2997 = vmatprep.mubr.msk.bf16.mxu0 %vm980_vm1, %v3231_v55 }
  0x85   : > { %2998 = vmatmul.mubr.msk.bf16.gmra.mrb[28].mxu0 %vm980_vm1, %v3232_v56 }
 0x120   : > { %v2971_v1 = vpop.f32.mrb[0].mxu0 }
 0x121   : > { %v1076_v2 = vadd.f32 %v2971_v1, %v3655_v0  ;;  %v1067_v3 = vpop.f32.mrb[1].mxu0 }
 0x122   : > { %v1068_v4 = vadd.f32 %v3655_v0, %v1067_v3  ;;  %v2972_v5 = vpop.f32.mrb[2].mxu0 }
 0x123   : > { %v1079_v6 = vadd.f32 %v2972_v5, %v3655_v0  ;;  %v1070_v7 = vpop.f32.mrb[3].mxu0  ;;  %v1196_v9 = vmax.f32 %v1076_v2, 0.0  ;;  %v3246_v2 = vld [vmem:[%s3616_s21 + $0x28] sm:$0xff]   ;;  %v3247_v5 = vld [vmem:[%s3616_s21 + $0x30] sm:$0xff]  }
 0x124   : > { %v1071_v8 = vadd.f32 %v3655_v0, %v1070_v7  ;;  %v1194_v11 = vmax.f32 %v1068_v4, 0.0 }
 0x125   : > { %v1197_v10 = vmax.f32 %v1079_v6, 0.0 }
 0x126   : > { %v1195_v12 = vmax.f32 %v1071_v8, 0.0  ;;  %v3262_v8 = vld [vmem:[%s4046_s9 + $0x28] sm:$0xff]  }
 0x127   : > { %v1244_v13 = vpack.c.bf16 %v1197_v10, %v1196_v9 }
 0x128   : > { %v1243_v14 = vpack.c.bf16 %v1195_v12, %v1194_v11  ;;  %v2975_v15 = vpop.f32.mrb[4].mxu0 }
 0x129   : > { %v1092_v17 = vadd.f32 %v2975_v15, %v3655_v0  ;;  %v1083_v18 = vpop.f32.mrb[5].mxu0 }
 0x12a   : > { %v1084_v19 = vadd.f32 %v3655_v0, %v1083_v18  ;;  %v2976_v20 = vpop.f32.mrb[6].mxu0  ;;  %3017 = vmatprep.mubr.bf16.mxu0 %v1243_v14 }
 0x12b   : > { %v1200_v21 = vmax.f32 %v1092_v17, 0.0  ;;  %v1095_v22 = vadd.f32 %v2976_v20, %v3655_v0  ;;  %v1086_v23 = vpop.f32.mrb[7].mxu0  ;;  %3018 = vmatmul.mubr.bf16.vlgmr.msra.gmra.mrb[32].mxu0 %v1244_v13 }
 0x12c   : > { %v1198_v24 = vmax.f32 %v1084_v19, 0.0  ;;  %v1087_v25 = vadd.f32 %v3655_v0, %v1086_v23  ;;  %3050 = vmatpush3.bf16.msra.mxu0 %v1714_v62  ;;  %3051 = vmatprep.mubr.msk.bf16.mxu0 %vm1660_vm4, %v3241_v16  ;;  %v3261_v62 = vld [vmem:[%s4046_s9 + $0x20] sm:$0xff]   ;;  %v3248_v19 = vld [vmem:[%s3616_s21 + $0x38] sm:$0xff]  }
 0x12d   : > { %v1201_v26 = vmax.f32 %v1095_v22, 0.0  ;;  %v3249_v22 = vld [vmem:[%s3616_s21 + $0x40] sm:$0xff]  }
 0x12e   : > { %v1199_v27 = vmax.f32 %v1087_v25, 0.0 }
 0x12f   : > { %v1246_v28 = vpack.c.bf16 %v1201_v26, %v1200_v21 }
 0x130   : > { %v2979_v30 = vpop.f32.mrb[8].mxu0  ;;  %v1245_v31 = vpack.c.bf16 %v1199_v27, %v1198_v24 }
 0x131   : > { %v1108_v33 = vadd.f32 %v2979_v30, %v3655_v0  ;;  %v1099_v34 = vpop.f32.mrb[9].mxu0 }
 0x132   : > { %v1100_v36 = vadd.f32 %v3655_v0, %v1099_v34  ;;  %v2980_v37 = vpop.f32.mrb[10].mxu0  ;;  %3021 = vmatprep.mubr.bf16.mxu1 %v1245_v31 }
 0x133   : > { %v1204_v38 = vmax.f32 %v1108_v33, 0.0  ;;  %v1111_v39 = vadd.f32 %v2980_v37, %v3655_v0  ;;  %v1102_v40 = vpop.f32.mrb[11].mxu0  ;;  %3022 = vmatmul.mubr.bf16.vlgmr.msra.gmra.mrb[0].mxu1 %v1246_v28  ;;  %3052 = vmatmul.mubr.msk.bf16.vlgmr.msra.gmra.mrb[36].mxu0 %vm1660_vm4, %v3242_v29 }
 0x134   : > { %v1202_v41 = vmax.f32 %v1100_v36, 0.0  ;;  %v1103_v42 = vadd.f32 %v3655_v0, %v1102_v40  ;;  %3055 = vmatprep.mubr.msk.bf16.mxu0 %vm1660_vm4, %v3243_v32  ;;  %3084 = vmatpush3.bf16.msra.mxu1 %v3257_v63 }
 0x135   : > { %v1205_v43 = vmax.f32 %v1111_v39, 0.0  ;;  %3085 = vmatprep.subr.bf16.mxu1 %v3258_v35 }
 0x136   : > { %v1203_v45 = vmax.f32 %v1103_v42, 0.0 }
 0x137   : > { %v1248_v46 = vpack.c.bf16 %v1205_v43, %v1204_v38  ;;  %v3251_v38 = vld [vmem:[%s3616_s21 + $0x50] sm:$0xff]  }
 0x138   : > { %v1247_v48 = vpack.c.bf16 %v1203_v45, %v1202_v41  ;;  %v2983_v49 = vpop.f32.mrb[12].mxu0  ;;  %3086 = vmatpush3.bf16.msra.mxu1 %v3258_v35  ;;  %v3250_v35 = vld [vmem:[%s3616_s21 + $0x48] sm:$0xff]  }
 0x139   : > { %v1124_v51 = vadd.f32 %v2983_v49, %v3655_v0  ;;  %v1115_v52 = vpop.f32.mrb[13].mxu0  ;;  %3087 = vmatprep.subr.bf16.mxu1 %v3259_v44 }
 0x13a   : > { %v1116_v54 = vadd.f32 %v3655_v0, %v1115_v52  ;;  %v2984_v55 = vpop.f32.mrb[14].mxu0  ;;  %3025 = vmatprep.mubr.bf16.mxu1 %v1247_v48 }
 0x13b   : > { %v1208_v56 = vmax.f32 %v1124_v51, 0.0  ;;  %v1127_v57 = vadd.f32 %v2984_v55, %v3655_v0  ;;  %v1118_v58 = vpop.f32.mrb[15].mxu0  ;;  %3026 = vmatmul.mubr.bf16.gmra.mrb[4].mxu1 %v1248_v46  ;;  %3056 = vmatmul.mubr.msk.bf16.gmra.mrb[40].mxu0 %vm1660_vm4, %v3244_v47  ;;  %v3252_v51 = vld [vmem:[%s3616_s21 + $0x58] sm:$0xff]  }
 0x13c   : > { %v1206_v59 = vmax.f32 %v1116_v54, 0.0  ;;  %v1119_v60 = vadd.f32 %v3655_v0, %v1118_v58  ;;  %3059 = vmatprep.mubr.msk.bf16.mxu0 %vm1660_vm4, %v3245_v50  ;;  %3088 = vmatpush3.bf16.msra.mxu1 %v3259_v44  ;;  %v3253_v54 = vld [vmem:[%s3616_s21 + $0x60] sm:$0xff]  }
 0x13d   : > { %v1209_v61 = vmax.f32 %v1127_v57, 0.0  ;;  %3089 = vmatprep.subr.bf16.mxu1 %v3260_v53 }
 0x13e   : > { %v1207_v63 = vmax.f32 %v1119_v60, 0.0 }
 0x13f   : > { %v1250_v1 = vpack.c.bf16 %v1209_v61, %v1208_v56 }
 0x140   : > { %v1249_v3 = vpack.c.bf16 %v1207_v63, %v1206_v59  ;;  %v2987_v4 = vpop.f32.mrb[16].mxu0  ;;  %3090 = vmatpush3.bf16.msra.mxu1 %v3260_v53 }
 0x141   : > { %v1140_v6 = vadd.f32 %v2987_v4, %v3655_v0  ;;  %v1131_v7 = vpop.f32.mrb[17].mxu0  ;;  %3091 = vmatprep.subr.bf16.mxu1 %v3261_v62  ;;  %v3254_v4 = vld [vmem:[%s3616_s21 + $0x68] sm:$0xff]  }
 0x142   : > { %v1132_v9 = vadd.f32 %v3655_v0, %v1131_v7  ;;  %v2988_v10 = vpop.f32.mrb[18].mxu0  ;;  %3029 = vmatprep.mubr.bf16.mxu1 %v1249_v3  ;;  %v3256_v7 = vld [vmem:[%s3616_s21 + $0x78] sm:$0xff]  }
 0x143   : > { %v1212_v11 = vmax.f32 %v1140_v6, 0.0  ;;  %v1143_v12 = vadd.f32 %v2988_v10, %v3655_v0  ;;  %v1134_v13 = vpop.f32.mrb[19].mxu0  ;;  %3030 = vmatmul.mubr.bf16.gmra.mrb[8].mxu1 %v1250_v1  ;;  %3060 = vmatmul.mubr.msk.bf16.gmra.mrb[44].mxu0 %vm1660_vm4, %v3246_v2  ;;  %v3255_v6 = vld [vmem:[%s3616_s21 + $0x70] sm:$0xff]   ;;  %v3266_v10 = vld [vmem:[%s4048_s11] sm:$0xff]   ;;  %s2721_s21 = sshll.u32 %s4070_s20, 2  ;;  %s3388_s20 = smov [#allocation4]  }
 0x144   : > { %v1210_v14 = vmax.f32 %v1132_v9, 0.0  ;;  %v1135_v15 = vadd.f32 %v3655_v0, %v1134_v13  ;;  %3063 = vmatprep.mubr.msk.bf16.mxu0 %vm1660_vm4, %v3247_v5  ;;  %3092 = vmatpush3.bf16.msra.mxu1 %v3261_v62  ;;  %v3265_v9 = vld [vmem:[%s4048_s11 + $0x40] sm:$0xff]   ;;  %v3269_v13 = vld [vmem:[%s4048_s11 + $0x50] sm:$0xff]   ;;  %s3794_s22 = scalar_lea.vmem %s4037_s0, %s2721_s21  ;;  %s3295_s18 = sshll.u32 %s3388_s20, 4  ;;  %s3296_s18 = int_to_ptr.vmem [resolvable:$false] %s3295_s18 }
 0x145   : > { %v1213_v16 = vmax.f32 %v1143_v12, 0.0  ;;  %3093 = vmatprep.subr.bf16.mxu1 %v3262_v8  ;;  %2929 = vmatprep.subr.bf16.mxu0 %v3265_v9  ;;  %v3268_v12 = vld [vmem:[%s4048_s11 + $0x8] sm:$0xff]   ;;  %p3298_p3 = scmp.lt.s32.totalorder %s3955_s27, %s3296_s18 }
 0x146   : > { %v1211_v17 = vmax.f32 %v1135_v15, 0.0  ;;  %2930 = vmatpush3.bf16.msra.mxu0 %v3266_v10  ;;  %v3271_v15 = vld [vmem:[%s4048_s11 + $0x58] sm:$0xff]  }
 0x147   : > { %v1252_v18 = vpack.c.bf16 %v1213_v16, %v1212_v11  ;;  %v3267_v11 = vld [vmem:[%s4048_s11 + $0x48] sm:$0xff]   ;;  %v3272_v16 = vld [vmem:[%s4048_s11 + $0x18] sm:$0xff]  }
 0x148   : > { %v1251_v20 = vpack.c.bf16 %v1211_v17, %v1210_v14  ;;  %v2991_v21 = vpop.f32.mrb[20].mxu0  ;;  %3094 = vmatpush3.bf16.msra.mxu1 %v3262_v8  ;;  %v3264_v8 = vld [vmem:[%s4046_s9 + $0x38] sm:$0xff]   ;;  %2931 = vmatprep.subr.bf16.mxu0 %v3267_v11  ;;  %v3270_v14 = vld [vmem:[%s4048_s11 + $0x10] sm:$0xff]   ;;  %v3273_v17 = vld [vmem:[%s4048_s11 + $0x60] sm:$0xff]  }
 0x149   : > { %v1156_v23 = vadd.f32 %v2991_v21, %v3655_v0  ;;  %v1147_v24 = vpop.f32.mrb[21].mxu0  ;;  %v3277_v21 = vld [vmem:[%s4048_s11 + $0x70] sm:$0xff]  }
 0x14a   : > { %v1148_v25 = vadd.f32 %v3655_v0, %v1147_v24  ;;  %v2992_v26 = vpop.f32.mrb[22].mxu0  ;;  %3033 = vmatprep.mubr.bf16.mxu1 %v1251_v20  ;;  %2932 = vmatpush3.bf16.msra.mxu0 %v3268_v12  ;;  %v3276_v20 = vld [vmem:[%s4048_s11 + $0x28] sm:$0xff]   ;;  %v3280_v24 = vld [vmem:[%s4048_s11 + $0x38] sm:$0xff]  }
 0x14b   : > { %v1216_v27 = vmax.f32 %v1156_v23, 0.0  ;;  %v1159_v28 = vadd.f32 %v2992_v26, %v3655_v0  ;;  %v1150_v29 = vpop.f32.mrb[23].mxu0  ;;  %3034 = vmatmul.mubr.bf16.gmra.mrb[12].mxu1 %v1252_v18  ;;  %3064 = vmatmul.mubr.msk.bf16.gmra.mrb[48].mxu0 %vm1660_vm4, %v3248_v19  ;;  %v3274_v18 = vld [vmem:[%s4048_s11 + $0x20] sm:$0xff]   ;;  %v3275_v19 = vld [vmem:[%s4048_s11 + $0x68] sm:$0xff]   ;;  %v3279_v23 = vld [vmem:[%s4048_s11 + $0x78] sm:$0xff]  }
 0x14c   : > { %v1214_v30 = vmax.f32 %v1148_v25, 0.0  ;;  %v1151_v31 = vadd.f32 %v3655_v0, %v1150_v29  ;;  %3067 = vmatprep.mubr.msk.bf16.mxu0 %vm1660_vm4, %v3249_v22  ;;  %2933 = vmatprep.subr.bf16.mxu0 %v3269_v13  ;;  %v3278_v22 = vld [vmem:[%s4048_s11 + $0x30] sm:$0xff]  }
 0x14d   : > { %v1217_v32 = vmax.f32 %v1159_v28, 0.0  ;;  %v3799_v28 = vld [vmem:[%s4043_s6] ss:$0 sm:$0xff] }
 0x14e   : > { %v1215_v33 = vmax.f32 %v1151_v31, 0.0  ;;  %2934 = vmatpush3.bf16.msra.mxu0 %v3270_v14 }
 0x14f   : > { %v1254_v34 = vpack.c.bf16 %v1217_v32, %v1216_v27  ;;  %2935 = vmatprep.subr.bf16.mxu0 %v3271_v15  ;;  %v3806_v32 = vld [vmem:[%s4045_s8] ss:$0 sm:$0xff] }
 0x150   : > { %v1253_v36 = vpack.c.bf16 %v1215_v33, %v1214_v30  ;;  %v2995_v37 = vpop.f32.mrb[24].mxu0 }
 0x151   : > { %v1172_v39 = vadd.f32 %v2995_v37, %v3655_v0  ;;  %v1163_v40 = vpop.f32.mrb[25].mxu0 }
 0x152   : > { %v1164_v41 = vadd.f32 %v3655_v0, %v1163_v40  ;;  %v2996_v42 = vpop.f32.mrb[26].mxu0  ;;  %3037 = vmatprep.mubr.bf16.mxu1 %v1253_v36  ;;  %2936 = vmatpush3.bf16.msra.mxu0 %v3272_v16 }
 0x153   : > { %v1220_v43 = vmax.f32 %v1172_v39, 0.0  ;;  %v1175_v44 = vadd.f32 %v2996_v42, %v3655_v0  ;;  %v1166_v45 = vpop.f32.mrb[27].mxu0  ;;  %3038 = vmatmul.mubr.bf16.gmra.mrb[16].mxu1 %v1254_v34  ;;  %3068 = vmatmul.mubr.msk.bf16.gmra.mrb[52].mxu0 %vm1660_vm4, %v3250_v35 }
 0x154   : > { %v1218_v46 = vmax.f32 %v1164_v41, 0.0  ;;  %v1167_v47 = vadd.f32 %v3655_v0, %v1166_v45  ;;  %3071 = vmatprep.mubr.msk.bf16.mxu0 %vm1660_vm4, %v3251_v38  ;;  %2937 = vmatprep.subr.bf16.mxu0 %v3273_v17 }
 0x155   : > { %v1221_v48 = vmax.f32 %v1175_v44, 0.0 }
 0x156   : > { %v1219_v49 = vmax.f32 %v1167_v47, 0.0  ;;  %2938 = vmatpush3.bf16.msra.mxu0 %v3274_v18 }
 0x157   : > { %v1256_v50 = vpack.c.bf16 %v1221_v48, %v1220_v43  ;;  %2939 = vmatprep.subr.bf16.mxu0 %v3275_v19 }
 0x158   : > { %v1255_v52 = vpack.c.bf16 %v1219_v49, %v1218_v46  ;;  %v2999_v53 = vpop.f32.mrb[28].mxu0 }
 0x159   : > { %v1188_v55 = vadd.f32 %v2999_v53, %v3655_v0  ;;  %v1179_v56 = vpop.f32.mrb[29].mxu0 }
 0x15a   : > { %v1180_v57 = vadd.f32 %v3655_v0, %v1179_v56  ;;  %v3000_v58 = vpop.f32.mrb[30].mxu0  ;;  %3041 = vmatprep.mubr.bf16.mxu1 %v1255_v52  ;;  %2940 = vmatpush3.bf16.msra.mxu0 %v3276_v20 }
 0x15b   : > { %v1224_v59 = vmax.f32 %v1188_v55, 0.0  ;;  %v1191_v60 = vadd.f32 %v3000_v58, %v3655_v0  ;;  %v1182_v61 = vpop.f32.mrb[31].mxu0  ;;  %3042 = vmatmul.mubr.bf16.gmra.mrb[20].mxu1 %v1256_v50  ;;  %3072 = vmatmul.mubr.msk.bf16.gmra.mrb[56].mxu0 %vm1660_vm4, %v3252_v51 }
 0x15c   : > { %v1222_v62 = vmax.f32 %v1180_v57, 0.0  ;;  %v1183_v63 = vadd.f32 %v3655_v0, %v1182_v61  ;;  %3075 = vmatprep.mubr.msk.bf16.mxu0 %vm1660_vm4, %v3253_v54  ;;  %v3263_v0 = vld [vmem:[%s4046_s9 + $0x30] sm:$0xff]   ;;  %2941 = vmatprep.subr.bf16.mxu0 %v3277_v21 }
 0x15d   : > { %v1225_v1 = vmax.f32 %v1191_v60, 0.0  ;;  %3095 = vmatprep.subr.bf16.mxu1 %v3263_v0 }
 0x15e   : > { %v1223_v2 = vmax.f32 %v1183_v63, 0.0  ;;  %3096 = vmatpush3.bf16.msra.mxu1 %v3263_v0  ;;  %2942 = vmatpush3.bf16.msra.mxu0 %v3278_v22 }
 0x15f   : > { %v1258_v3 = vpack.c.bf16 %v1225_v1, %v1224_v59  ;;  %3097 = vmatprep.subr.bf16.mxu1 %v3264_v8  ;;  %2943 = vmatprep.subr.bf16.mxu0 %v3279_v23 }
 0x160   : > { %v1257_v5 = vpack.c.bf16 %v1223_v2, %v1222_v62 }
 0x162   : > { %3045 = vmatprep.mubr.bf16.mxu1 %v1257_v5  ;;  %3098 = vmatpush3.bf16.msra.mxu1 %v3264_v8 }
 0x163   : > { %3046 = vmatmul.mubr.bf16.gmra.mrb[24].mxu1 %v1258_v3  ;;  %3076 = vmatmul.mubr.msk.bf16.gmra.mrb[60].mxu0 %vm1660_vm4, %v3254_v4 }
 0x164   : > { %3079 = vmatprep.mubr.msk.bf16.mxu0 %vm1660_vm4, %v3255_v6  ;;  %2944 = vmatpush3.bf16.msra.mxu0 %v3280_v24 }
 0x16b   : > { %3080 = vmatmul.mubr.msk.bf16.gmra.mrb[64].mxu0 %vm1660_vm4, %v3256_v7 }
 0x1fe   : > { %v3019_v25 = vpop.f32.mrb[32].mxu0 }
 0x1ff   : > { %v1347_v26 = vpop.f32.mrb[33].mxu0  ;;  %v1356_v30 = vadd.f32 %v3019_v25, %v3799_v28 }
 0x200   : > { %v3020_v27 = vpop.f32.mrb[34].mxu0  ;;  %v1348_v31 = vadd.f32 %v3799_v28, %v1347_v26 }
 0x201   : > { %v1350_v29 = vpop.f32.mrb[35].mxu0  ;;  %v1359_v33 = vadd.f32 %v3020_v27, %v3799_v28  ;;  %v1476_v41 = vmax.f32 %v1356_v30, 0.0 }
 0x202   : > { %v1351_v34 = vadd.f32 %v3799_v28, %v1350_v29  ;;  %v1474_v42 = vmax.f32 %v1348_v31, 0.0 }
 0x203   : > { %v1477_v47 = vmax.f32 %v1359_v33, 0.0 }
 0x204   : > { %v1475_v53 = vmax.f32 %v1351_v34, 0.0 }
 0x206   : > { %v3023_v35 = vpop.f32.mrb[0].mxu1  ;;  %v3053_v36 = vpop.f32.mrb[36].mxu0 }
 0x207   : > { %v1372_v37 = vadd.f32 %v3023_v35, %v3799_v28  ;;  %v1759_v38 = vadd.f32 %v3053_v36, %v3806_v32  ;;  %v1363_v39 = vpop.f32.mrb[1].mxu1  ;;  %v1750_v40 = vpop.f32.mrb[37].mxu0 }
 0x208   : > { %v1364_v43 = vadd.f32 %v3799_v28, %v1363_v39  ;;  %v1751_v44 = vadd.f32 %v3806_v32, %v1750_v40  ;;  %v3024_v45 = vpop.f32.mrb[2].mxu1  ;;  %v3054_v46 = vpop.f32.mrb[38].mxu0 }
 0x209   : > { %v1480_v48 = vmax.f32 %v1372_v37, 0.0  ;;  %v1375_v49 = vadd.f32 %v3024_v45, %v3799_v28  ;;  %v1762_v50 = vadd.f32 %v3054_v46, %v3806_v32  ;;  %v1366_v51 = vpop.f32.mrb[3].mxu1  ;;  %v1753_v52 = vpop.f32.mrb[39].mxu0  ;;  %v1879_v58 = vmax.f32 %v1759_v38, 0.0 }
 0x20a   : > { %v1478_v54 = vmax.f32 %v1364_v43, 0.0  ;;  %v1367_v55 = vadd.f32 %v3799_v28, %v1366_v51  ;;  %v1754_v56 = vadd.f32 %v3806_v32, %v1753_v52  ;;  %v1877_v62 = vmax.f32 %v1751_v44, 0.0 }
 0x20b   : > { %v1508_v57 = vmax.f32 %v1476_v41, %v1480_v48  ;;  %v1481_v59 = vmax.f32 %v1375_v49, 0.0  ;;  %v1880_v60 = vmax.f32 %v1762_v50, 0.0 }
 0x20c   : > { %v1506_v61 = vmax.f32 %v1474_v42, %v1478_v54  ;;  %v1479_v63 = vmax.f32 %v1367_v55, 0.0  ;;  %v1878_v1 = vmax.f32 %v1754_v56, 0.0 }
 0x20d   : > { %v1509_v2 = vmax.f32 %v1477_v47, %v1481_v59  ;;  %v1927_v3 = vpack.c.bf16 %v1880_v60, %v1879_v58 }
 0x20e   : > { %v1507_v4 = vmax.f32 %v1475_v53, %v1479_v63  ;;  %v1926_v5 = vpack.c.bf16 %v1878_v1, %v1877_v62  ;;  %v3027_v6 = vpop.f32.mrb[4].mxu1  ;;  %v3057_v7 = vpop.f32.mrb[40].mxu0 }
 0x20f   : > { %v1388_v0 = vadd.f32 %v3027_v6, %v3799_v28  ;;  %v1775_v8 = vadd.f32 %v3057_v7, %v3806_v32  ;;  %v1379_v9 = vpop.f32.mrb[5].mxu1  ;;  %v1766_v10 = vpop.f32.mrb[41].mxu0 }
 0x210   : > { %v1380_v11 = vadd.f32 %v3799_v28, %v1379_v9  ;;  %v1767_v12 = vadd.f32 %v3806_v32, %v1766_v10  ;;  %v3028_v13 = vpop.f32.mrb[6].mxu1  ;;  %v3058_v14 = vpop.f32.mrb[42].mxu0  ;;  %3099 = vmatprep.mubr.bf16.mxu1 %v1926_v5 }
 0x211   : > { %v1484_v15 = vmax.f32 %v1388_v0, 0.0  ;;  %v1391_v16 = vadd.f32 %v3028_v13, %v3799_v28  ;;  %v1778_v17 = vadd.f32 %v3058_v14, %v3806_v32  ;;  %v1382_v18 = vpop.f32.mrb[7].mxu1  ;;  %v1769_v19 = vpop.f32.mrb[43].mxu0  ;;  %3100 = vmatmul.mubr.bf16.vlgmr.msra.gmra.mrb[28].mxu1 %v1927_v3  ;;  %v1883_v24 = vmax.f32 %v1775_v8, 0.0 }
 0x212   : > { %v1482_v20 = vmax.f32 %v1380_v11, 0.0  ;;  %v1383_v21 = vadd.f32 %v3799_v28, %v1382_v18  ;;  %v1770_v22 = vadd.f32 %v3806_v32, %v1769_v19  ;;  %v1881_v29 = vmax.f32 %v1767_v12, 0.0 }
 0x213   : > { %v1512_v23 = vmax.f32 %v1508_v57, %v1484_v15  ;;  %v1485_v25 = vmax.f32 %v1391_v16, 0.0  ;;  %v1884_v26 = vmax.f32 %v1778_v17, 0.0 }
 0x214   : > { %v1510_v27 = vmax.f32 %v1506_v61, %v1482_v20  ;;  %v1483_v30 = vmax.f32 %v1383_v21, 0.0  ;;  %v1882_v31 = vmax.f32 %v1770_v22, 0.0 }
 0x215   : > { %v1513_v33 = vmax.f32 %v1509_v2, %v1485_v25  ;;  %v1929_v34 = vpack.c.bf16 %v1884_v26, %v1883_v24 }
 0x216   : > { %v1511_v35 = vmax.f32 %v1507_v4, %v1483_v30  ;;  %v1928_v36 = vpack.c.bf16 %v1882_v31, %v1881_v29  ;;  %v3031_v37 = vpop.f32.mrb[8].mxu1  ;;  %v3061_v38 = vpop.f32.mrb[44].mxu0 }
 0x217   : > { %v1404_v39 = vadd.f32 %v3031_v37, %v3799_v28  ;;  %v1791_v40 = vadd.f32 %v3061_v38, %v3806_v32  ;;  %v1395_v41 = vpop.f32.mrb[9].mxu1  ;;  %v1782_v42 = vpop.f32.mrb[45].mxu0 }
 0x218   : > { %v1396_v43 = vadd.f32 %v3799_v28, %v1395_v41  ;;  %v1783_v44 = vadd.f32 %v3806_v32, %v1782_v42  ;;  %v3032_v45 = vpop.f32.mrb[10].mxu1  ;;  %v3062_v46 = vpop.f32.mrb[46].mxu0  ;;  %3103 = vmatprep.mubr.bf16.mxu1 %v1928_v36 }
 0x219   : > { %v1488_v47 = vmax.f32 %v1404_v39, 0.0  ;;  %v1407_v48 = vadd.f32 %v3032_v45, %v3799_v28  ;;  %v1794_v49 = vadd.f32 %v3062_v46, %v3806_v32  ;;  %v1398_v50 = vpop.f32.mrb[11].mxu1  ;;  %v1785_v51 = vpop.f32.mrb[47].mxu0  ;;  %3104 = vmatmul.mubr.bf16.gmra.mrb[32].mxu1 %v1929_v34  ;;  %v1887_v56 = vmax.f32 %v1791_v40, 0.0 }
 0x21a   : > { %v1486_v52 = vmax.f32 %v1396_v43, 0.0  ;;  %v1399_v53 = vadd.f32 %v3799_v28, %v1398_v50  ;;  %v1786_v54 = vadd.f32 %v3806_v32, %v1785_v51  ;;  %v1885_v60 = vmax.f32 %v1783_v44, 0.0 }
 0x21b   : > { %v1516_v55 = vmax.f32 %v1512_v23, %v1488_v47  ;;  %v1489_v57 = vmax.f32 %v1407_v48, 0.0  ;;  %v1888_v58 = vmax.f32 %v1794_v49, 0.0 }
 0x21c   : > { %v1514_v59 = vmax.f32 %v1510_v27, %v1486_v52  ;;  %v1487_v61 = vmax.f32 %v1399_v53, 0.0  ;;  %v1886_v62 = vmax.f32 %v1786_v54, 0.0 }
 0x21d   : > { %v1517_v63 = vmax.f32 %v1513_v33, %v1489_v57  ;;  %v1931_v1 = vpack.c.bf16 %v1888_v58, %v1887_v56 }
 0x21e   : > { %v1515_v2 = vmax.f32 %v1511_v35, %v1487_v61  ;;  %v1930_v3 = vpack.c.bf16 %v1886_v62, %v1885_v60  ;;  %v3035_v4 = vpop.f32.mrb[12].mxu1  ;;  %v3065_v5 = vpop.f32.mrb[48].mxu0 }
 0x21f   : > { %v1420_v6 = vadd.f32 %v3035_v4, %v3799_v28  ;;  %v1807_v7 = vadd.f32 %v3065_v5, %v3806_v32  ;;  %v1411_v0 = vpop.f32.mrb[13].mxu1  ;;  %v1798_v8 = vpop.f32.mrb[49].mxu0 }
 0x220   : > { %v1412_v9 = vadd.f32 %v3799_v28, %v1411_v0  ;;  %v1799_v10 = vadd.f32 %v3806_v32, %v1798_v8  ;;  %v3036_v11 = vpop.f32.mrb[14].mxu1  ;;  %v3066_v12 = vpop.f32.mrb[50].mxu0  ;;  %3107 = vmatprep.mubr.bf16.mxu1 %v1930_v3 }
 0x221   : > { %v1492_v13 = vmax.f32 %v1420_v6, 0.0  ;;  %v1423_v14 = vadd.f32 %v3036_v11, %v3799_v28  ;;  %v1810_v15 = vadd.f32 %v3066_v12, %v3806_v32  ;;  %v1414_v16 = vpop.f32.mrb[15].mxu1  ;;  %v1801_v17 = vpop.f32.mrb[51].mxu0  ;;  %3108 = vmatmul.mubr.bf16.gmra.mrb[36].mxu1 %v1931_v1  ;;  %v1891_v22 = vmax.f32 %v1807_v7, 0.0 }
 0x222   : > { %v1490_v18 = vmax.f32 %v1412_v9, 0.0  ;;  %v1415_v19 = vadd.f32 %v3799_v28, %v1414_v16  ;;  %v1802_v20 = vadd.f32 %v3806_v32, %v1801_v17  ;;  %v1889_v26 = vmax.f32 %v1799_v10, 0.0 }
 0x223   : > { %v1520_v21 = vmax.f32 %v1516_v55, %v1492_v13  ;;  %v1493_v23 = vmax.f32 %v1423_v14, 0.0  ;;  %v1892_v24 = vmax.f32 %v1810_v15, 0.0 }
 0x224   : > { %v1518_v25 = vmax.f32 %v1514_v59, %v1490_v18  ;;  %v1491_v27 = vmax.f32 %v1415_v19, 0.0  ;;  %v1890_v29 = vmax.f32 %v1802_v20, 0.0 }
 0x225   : > { %v1521_v30 = vmax.f32 %v1517_v63, %v1493_v23  ;;  %v1933_v31 = vpack.c.bf16 %v1892_v24, %v1891_v22 }
 0x226   : > { %v1519_v33 = vmax.f32 %v1515_v2, %v1491_v27  ;;  %v1932_v34 = vpack.c.bf16 %v1890_v29, %v1889_v26  ;;  %v3039_v35 = vpop.f32.mrb[16].mxu1  ;;  %v3069_v36 = vpop.f32.mrb[52].mxu0 }
 0x227   : > { %v1436_v37 = vadd.f32 %v3039_v35, %v3799_v28  ;;  %v1823_v38 = vadd.f32 %v3069_v36, %v3806_v32  ;;  %v1427_v39 = vpop.f32.mrb[17].mxu1  ;;  %v1814_v40 = vpop.f32.mrb[53].mxu0 }
 0x228   : > { %v1428_v41 = vadd.f32 %v3799_v28, %v1427_v39  ;;  %v1815_v42 = vadd.f32 %v3806_v32, %v1814_v40  ;;  %v3040_v43 = vpop.f32.mrb[18].mxu1  ;;  %v3070_v44 = vpop.f32.mrb[54].mxu0  ;;  %3111 = vmatprep.mubr.bf16.mxu1 %v1932_v34 }
 0x229   : > { %v1496_v45 = vmax.f32 %v1436_v37, 0.0  ;;  %v1439_v46 = vadd.f32 %v3040_v43, %v3799_v28  ;;  %v1826_v47 = vadd.f32 %v3070_v44, %v3806_v32  ;;  %v1430_v48 = vpop.f32.mrb[19].mxu1  ;;  %v1817_v49 = vpop.f32.mrb[55].mxu0  ;;  %3112 = vmatmul.mubr.bf16.gmra.mrb[40].mxu1 %v1933_v31  ;;  %v1895_v54 = vmax.f32 %v1823_v38, 0.0 }
 0x22a   : > { %v1494_v50 = vmax.f32 %v1428_v41, 0.0  ;;  %v1431_v51 = vadd.f32 %v3799_v28, %v1430_v48  ;;  %v1818_v52 = vadd.f32 %v3806_v32, %v1817_v49  ;;  %v1893_v58 = vmax.f32 %v1815_v42, 0.0 }
 0x22b   : > { %v1524_v53 = vmax.f32 %v1520_v21, %v1496_v45  ;;  %v1497_v55 = vmax.f32 %v1439_v46, 0.0  ;;  %v1896_v56 = vmax.f32 %v1826_v47, 0.0 }
 0x22c   : > { %v1522_v57 = vmax.f32 %v1518_v25, %v1494_v50  ;;  %v1495_v59 = vmax.f32 %v1431_v51, 0.0  ;;  %v1894_v60 = vmax.f32 %v1818_v52, 0.0 }
 0x22d   : > { %v1525_v61 = vmax.f32 %v1521_v30, %v1497_v55  ;;  %v1935_v62 = vpack.c.bf16 %v1896_v56, %v1895_v54 }
 0x22e   : > { %v1523_v63 = vmax.f32 %v1519_v33, %v1495_v59  ;;  %v1934_v1 = vpack.c.bf16 %v1894_v60, %v1893_v58  ;;  %v3043_v2 = vpop.f32.mrb[20].mxu1  ;;  %v3073_v3 = vpop.f32.mrb[56].mxu0 }
 0x22f   : > { %v1452_v4 = vadd.f32 %v3043_v2, %v3799_v28  ;;  %v1839_v5 = vadd.f32 %v3073_v3, %v3806_v32  ;;  %v1443_v6 = vpop.f32.mrb[21].mxu1  ;;  %v1830_v7 = vpop.f32.mrb[57].mxu0  ;;  %v3281_v2 = vld [vmem:[%s3794_s22] sm:$0xff]  }
 0x230   : > { %v1444_v0 = vadd.f32 %v3799_v28, %v1443_v6  ;;  %v1831_v8 = vadd.f32 %v3806_v32, %v1830_v7  ;;  %v3044_v9 = vpop.f32.mrb[22].mxu1  ;;  %v3074_v10 = vpop.f32.mrb[58].mxu0  ;;  %3115 = vmatprep.mubr.bf16.mxu1 %v1934_v1 }
 0x231   : > { %v1500_v11 = vmax.f32 %v1452_v4, 0.0  ;;  %v1455_v12 = vadd.f32 %v3044_v9, %v3799_v28  ;;  %v1842_v13 = vadd.f32 %v3074_v10, %v3806_v32  ;;  %v1446_v14 = vpop.f32.mrb[23].mxu1  ;;  %v1833_v15 = vpop.f32.mrb[59].mxu0  ;;  %3116 = vmatmul.mubr.bf16.gmra.mrb[44].mxu1 %v1935_v62  ;;  %v1899_v20 = vmax.f32 %v1839_v5, 0.0 }
 0x232   : > { %v1498_v16 = vmax.f32 %v1444_v0, 0.0  ;;  %v1447_v17 = vadd.f32 %v3799_v28, %v1446_v14  ;;  %v1834_v18 = vadd.f32 %v3806_v32, %v1833_v15  ;;  %v1897_v24 = vmax.f32 %v1831_v8, 0.0  ;;  %v3282_v15 = vld [vmem:[%s4048_s11 + $0x80] sm:$0xff]  }
 0x233   : > { %v1528_v19 = vmax.f32 %v1524_v53, %v1500_v11  ;;  %v1501_v21 = vmax.f32 %v1455_v12, 0.0  ;;  %v1900_v22 = vmax.f32 %v1842_v13, 0.0  ;;  %3131 = vmatprep.subr.bf16.mxu1 %v3282_v15 }
 0x234   : > { %v1526_v23 = vmax.f32 %v1522_v57, %v1498_v16  ;;  %v1499_v25 = vmax.f32 %v1447_v17, 0.0  ;;  %v1898_v26 = vmax.f32 %v1834_v18, 0.0  ;;  %3132 = vmatpush3.bf16.msra.mxu1 %v3282_v15  ;;  %v3284_v16 = vld [vmem:[%s4048_s11 + $0x90] sm:$0xff]   ;;  %v3285_v17 = vld [vmem:[%s4048_s11 + $0x98] sm:$0xff]   ;;  %v3286_v18 = vld [vmem:[%s4048_s11 + $0xa0] sm:$0xff]  }
 0x235   : > { %v1529_v27 = vmax.f32 %v1525_v61, %v1501_v21  ;;  %v1937_v29 = vpack.c.bf16 %v1900_v22, %v1899_v20  ;;  %v3288_v20 = vld [vmem:[%s4048_s11 + $0xb0] sm:$0xff]   ;;  %v3290_v21 = vld [vmem:[%s3794_s22 + $0x8] sm:$0xff]   ;;  %v3289_v22 = vld [vmem:[%s4048_s11 + $0xb8] sm:$0xff]   ;;  %s2845_s22 = sshll.u32 %s3490_s17, 10 }
 0x236   : > { %v1527_v30 = vmax.f32 %v1523_v63, %v1499_v25  ;;  %v1936_v31 = vpack.c.bf16 %v1898_v26, %v1897_v24  ;;  %v3047_v33 = vpop.f32.mrb[24].mxu1  ;;  %v3077_v34 = vpop.f32.mrb[60].mxu0  ;;  %s3953_s28 = scalar_lea.hbm %s4050_s13, %s2845_s22 }
 0x237   : > { %v1468_v35 = vadd.f32 %v3047_v33, %v3799_v28  ;;  %v1855_v36 = vadd.f32 %v3077_v34, %v3806_v32  ;;  %v1459_v37 = vpop.f32.mrb[25].mxu1  ;;  %v1846_v38 = vpop.f32.mrb[61].mxu0 }
 0x238   : > { %v1460_v39 = vadd.f32 %v3799_v28, %v1459_v37  ;;  %v1847_v40 = vadd.f32 %v3806_v32, %v1846_v38  ;;  %v3048_v41 = vpop.f32.mrb[26].mxu1  ;;  %v3078_v42 = vpop.f32.mrb[62].mxu0  ;;  %3119 = vmatprep.mubr.bf16.mxu1 %v1936_v31 }
 0x239   : > { %v1504_v43 = vmax.f32 %v1468_v35, 0.0  ;;  %v1471_v44 = vadd.f32 %v3048_v41, %v3799_v28  ;;  %v1858_v45 = vadd.f32 %v3078_v42, %v3806_v32  ;;  %v1462_v46 = vpop.f32.mrb[27].mxu1  ;;  %v1849_v47 = vpop.f32.mrb[63].mxu0  ;;  %3120 = vmatmul.mubr.bf16.gmra.mrb[48].mxu1 %v1937_v29  ;;  %v1903_v52 = vmax.f32 %v1855_v36, 0.0 }
 0x23a   : > { %v1502_v48 = vmax.f32 %v1460_v39, 0.0  ;;  %v1463_v49 = vadd.f32 %v3799_v28, %v1462_v46  ;;  %v1850_v50 = vadd.f32 %v3806_v32, %v1849_v47  ;;  %v1901_v56 = vmax.f32 %v1847_v40, 0.0 }
 0x23b   : > { %v1532_v51 = vmax.f32 %v1528_v19, %v1504_v43  ;;  %v1505_v53 = vmax.f32 %v1471_v44, 0.0  ;;  %v1904_v54 = vmax.f32 %v1858_v45, 0.0  ;;  %v3287_v19 = vld [vmem:[%s4048_s11 + $0xa8] sm:$0xff]  }
 0x23c   : > { %v1530_v55 = vmax.f32 %v1526_v23, %v1502_v48  ;;  %v1503_v57 = vmax.f32 %v1463_v49, 0.0  ;;  %v1902_v58 = vmax.f32 %v1850_v50, 0.0 }
 0x23d   : > { %1536 = vst [vmem:[%s3867_s1 + $0x20] sm:$0xff] %v1532_v51  ;;  %v1533_v59 = vmax.f32 %v1529_v27, %v1505_v53  ;;  %v1939_v28 = vpack.c.bf16 %v1904_v54, %v1903_v52  ;;  %v3906_v27 = vld [vmem:[%s4047_s10] ss:$0 sm:$0xff] }
 0x23e   : > { %1534 = vst [vmem:[%s3867_s1] sm:$0xff] %v1530_v55  ;;  %v1531_v60 = vmax.f32 %v1527_v30, %v1503_v57  ;;  %v1938_v61 = vpack.c.bf16 %v1902_v58, %v1901_v56  ;;  %v3081_v62 = vpop.f32.mrb[64].mxu0 }
 0x23f   : > { %1537 = vst [vmem:[%s3867_s1 + $0x30] sm:$0xff] %v1533_v59  ;;  %v1871_v63 = vadd.f32 %v3081_v62, %v3806_v32  ;;  %v1862_v1 = vpop.f32.mrb[65].mxu0  ;;  %v1539_v3 = vpack.c.bf16 %v1533_v59, %v1532_v51 }
 0x240   : > { %1535 = vst [vmem:[%s3867_s1 + $0x10] sm:$0xff] %v1531_v60  ;;  %v1863_v4 = vadd.f32 %v3806_v32, %v1862_v1  ;;  %v3082_v5 = vpop.f32.mrb[66].mxu0  ;;  %3123 = vmatprep.mubr.bf16.mxu1 %v1938_v61  ;;  %v1538_v6 = vpack.c.bf16 %v1531_v60, %v1530_v55 }
 0x241   : > { %v1874_v7 = vadd.f32 %v3082_v5, %v3806_v32  ;;  %v1865_v0 = vpop.f32.mrb[67].mxu0  ;;  %3124 = vmatmul.mubr.bf16.gmra.mrb[52].mxu1 %v1939_v28  ;;  %v1907_v9 = vmax.f32 %v1871_v63, 0.0 }
 0x242   : > { %v1866_v8 = vadd.f32 %v3806_v32, %v1865_v0  ;;  %2466 = vmatprep.mubr.bf16.mxu0 %v1538_v6  ;;  %v1905_v11 = vmax.f32 %v1863_v4, 0.0  ;;  %v3283_v32 = vld [vmem:[%s4048_s11 + $0x88] sm:$0xff]  }
 0x243   : > { %v1908_v10 = vmax.f32 %v1874_v7, 0.0  ;;  %2467 = vmatmul.mubr.bf16.vlgmr.msra.gmra.mrb[68].mxu0 %v3281_v2  ;;  %3133 = vmatprep.subr.bf16.mxu1 %v3283_v32 }
 0x244   : > { %v1906_v12 = vmax.f32 %v1866_v8, 0.0  ;;  %2474 = vmatprep.mubr.bf16.mxu0 %v1539_v3  ;;  %3134 = vmatpush3.bf16.msra.mxu1 %v3283_v32 }
 0x245   : > { %v1941_v13 = vpack.c.bf16 %v1908_v10, %v1907_v9  ;;  %3135 = vmatprep.subr.bf16.mxu1 %v3284_v16 }
 0x246   : > { %v1940_v14 = vpack.c.bf16 %v1906_v12, %v1905_v11 }
 0x248   : > { %3127 = vmatprep.mubr.bf16.mxu1 %v1940_v14  ;;  %3136 = vmatpush3.bf16.msra.mxu1 %v3284_v16 }
 0x249   : > { %3128 = vmatmul.mubr.bf16.gmra.mrb[56].mxu1 %v1941_v13  ;;  %3137 = vmatprep.subr.bf16.mxu1 %v3285_v17 }
 0x24b   : > { %2475 = vmatmul.mubr.bf16.gmra.mrb[72].mxu0 %v3290_v21 }
 0x24c   : > { %3138 = vmatpush3.bf16.msra.mxu1 %v3285_v17 }
 0x24d   : > { %3139 = vmatprep.subr.bf16.mxu1 %v3286_v18 }
 0x250   : > { %3140 = vmatpush3.bf16.msra.mxu1 %v3286_v18 }
 0x251   : > { %3141 = vmatprep.subr.bf16.mxu1 %v3287_v19 }
 0x254   : > { %3142 = vmatpush3.bf16.msra.mxu1 %v3287_v19 }
 0x255   : > { %3143 = vmatprep.subr.bf16.mxu1 %v3288_v20 }
 0x258   : > { %3144 = vmatpush3.bf16.msra.mxu1 %v3288_v20 }
 0x259   : > { %3145 = vmatprep.subr.bf16.mxu1 %v3289_v22 }
 0x25c   : > { %3146 = vmatpush3.bf16.msra.mxu1 %v3289_v22 }
 0x2e4   : > { %v3101_v23 = vpop.f32.mrb[28].mxu1 }
 0x2e5   : > { %v2030_v24 = vpop.f32.mrb[29].mxu1  ;;  %v2039_v29 = vadd.f32 %v3101_v23, %v3906_v27 }
 0x2e6   : > { %v3102_v25 = vpop.f32.mrb[30].mxu1  ;;  %v2031_v30 = vadd.f32 %v3906_v27, %v2030_v24 }
 0x2e7   : > { %v2033_v26 = vpop.f32.mrb[31].mxu1  ;;  %v2042_v33 = vadd.f32 %v3102_v25, %v3906_v27  ;;  %v2159_v39 = vmax.f32 %v2039_v29, 0.0 }
 0x2e8   : > { %v2034_v36 = vadd.f32 %v3906_v27, %v2033_v26  ;;  %v2157_v43 = vmax.f32 %v2031_v30, 0.0 }
 0x2e9   : > { %v2160_v46 = vmax.f32 %v2042_v33, 0.0 }
 0x2ea   : > { %v2158_v49 = vmax.f32 %v2034_v36, 0.0 }
 0x2ec   : > { %v3105_v31 = vpop.f32.mrb[32].mxu1 }
 0x2ed   : > { %v2055_v34 = vadd.f32 %v3105_v31, %v3906_v27  ;;  %v2046_v35 = vpop.f32.mrb[33].mxu1 }
 0x2ee   : > { %v2047_v37 = vadd.f32 %v3906_v27, %v2046_v35  ;;  %v3106_v38 = vpop.f32.mrb[34].mxu1 }
 0x2ef   : > { %v2163_v40 = vmax.f32 %v2055_v34, 0.0  ;;  %v2058_v41 = vadd.f32 %v3106_v38, %v3906_v27  ;;  %v2049_v42 = vpop.f32.mrb[35].mxu1 }
 0x2f0   : > { %v2161_v44 = vmax.f32 %v2047_v37, 0.0  ;;  %v2050_v45 = vadd.f32 %v3906_v27, %v2049_v42 }
 0x2f1   : > { %v2191_v47 = vmax.f32 %v2159_v39, %v2163_v40  ;;  %v2164_v48 = vmax.f32 %v2058_v41, 0.0 }
 0x2f2   : > { %v2189_v50 = vmax.f32 %v2157_v43, %v2161_v44  ;;  %v2162_v51 = vmax.f32 %v2050_v45, 0.0 }
 0x2f3   : > { %v2192_v52 = vmax.f32 %v2160_v46, %v2164_v48 }
 0x2f4   : > { %v2190_v53 = vmax.f32 %v2158_v49, %v2162_v51  ;;  %v3109_v54 = vpop.f32.mrb[36].mxu1 }
 0x2f5   : > { %v2071_v55 = vadd.f32 %v3109_v54, %v3906_v27  ;;  %v2062_v56 = vpop.f32.mrb[37].mxu1 }
 0x2f6   : > { %v2063_v57 = vadd.f32 %v3906_v27, %v2062_v56  ;;  %v3110_v58 = vpop.f32.mrb[38].mxu1 }
 0x2f7   : > { %v2167_v59 = vmax.f32 %v2071_v55, 0.0  ;;  %v2074_v28 = vadd.f32 %v3110_v58, %v3906_v27  ;;  %v2065_v60 = vpop.f32.mrb[39].mxu1 }
 0x2f8   : > { %v2165_v61 = vmax.f32 %v2063_v57, 0.0  ;;  %v2066_v62 = vadd.f32 %v3906_v27, %v2065_v60 }
 0x2f9   : > { %v2195_v63 = vmax.f32 %v2191_v47, %v2167_v59  ;;  %v2168_v1 = vmax.f32 %v2074_v28, 0.0 }
 0x2fa   : > { %v2193_v2 = vmax.f32 %v2189_v50, %v2165_v61  ;;  %v2166_v3 = vmax.f32 %v2066_v62, 0.0 }
 0x2fb   : > { %v2196_v4 = vmax.f32 %v2192_v52, %v2168_v1 }
 0x2fc   : > { %v2194_v5 = vmax.f32 %v2190_v53, %v2166_v3  ;;  %v3113_v6 = vpop.f32.mrb[40].mxu1 }
 0x2fd   : > { %v2087_v7 = vadd.f32 %v3113_v6, %v3906_v27  ;;  %v2078_v0 = vpop.f32.mrb[41].mxu1 }
 0x2fe   : > { %v2079_v8 = vadd.f32 %v3906_v27, %v2078_v0  ;;  %v3114_v9 = vpop.f32.mrb[42].mxu1 }
 0x2ff   : > { %v2171_v10 = vmax.f32 %v2087_v7, 0.0  ;;  %v2090_v11 = vadd.f32 %v3114_v9, %v3906_v27  ;;  %v2081_v12 = vpop.f32.mrb[43].mxu1 }
 0x300   : > { %v2169_v13 = vmax.f32 %v2079_v8, 0.0  ;;  %v2082_v14 = vadd.f32 %v3906_v27, %v2081_v12 }
 0x301   : > { %v2199_v15 = vmax.f32 %v2195_v63, %v2171_v10  ;;  %v2172_v32 = vmax.f32 %v2090_v11, 0.0 }
 0x302   : > { %v2197_v16 = vmax.f32 %v2193_v2, %v2169_v13  ;;  %v2170_v17 = vmax.f32 %v2082_v14, 0.0 }
 0x303   : > { %v2200_v18 = vmax.f32 %v2196_v4, %v2172_v32 }
 0x304   : > { %v2198_v19 = vmax.f32 %v2194_v5, %v2170_v17  ;;  %v3117_v20 = vpop.f32.mrb[44].mxu1 }
 0x305   : > { %v2103_v21 = vadd.f32 %v3117_v20, %v3906_v27  ;;  %v2094_v22 = vpop.f32.mrb[45].mxu1 }
 0x306   : > { %v2095_v23 = vadd.f32 %v3906_v27, %v2094_v22  ;;  %v3118_v24 = vpop.f32.mrb[46].mxu1 }
 0x307   : > { %v2175_v25 = vmax.f32 %v2103_v21, 0.0  ;;  %v2106_v26 = vadd.f32 %v3118_v24, %v3906_v27  ;;  %v2097_v29 = vpop.f32.mrb[47].mxu1 }
 0x308   : > { %v2173_v30 = vmax.f32 %v2095_v23, 0.0  ;;  %v2098_v31 = vadd.f32 %v3906_v27, %v2097_v29 }
 0x309   : > { %v2203_v33 = vmax.f32 %v2199_v15, %v2175_v25  ;;  %v2176_v34 = vmax.f32 %v2106_v26, 0.0 }
 0x30a   : > { %v2201_v35 = vmax.f32 %v2197_v16, %v2173_v30  ;;  %v2174_v36 = vmax.f32 %v2098_v31, 0.0 }
 0x30b   : > { %v2204_v37 = vmax.f32 %v2200_v18, %v2176_v34 }
 0x30c   : > { %v2202_v38 = vmax.f32 %v2198_v19, %v2174_v36  ;;  %v3121_v39 = vpop.f32.mrb[48].mxu1 }
 0x30d   : > { %v2119_v40 = vadd.f32 %v3121_v39, %v3906_v27  ;;  %v2110_v41 = vpop.f32.mrb[49].mxu1 }
 0x30e   : > { %v2111_v42 = vadd.f32 %v3906_v27, %v2110_v41  ;;  %v3122_v43 = vpop.f32.mrb[50].mxu1 }
 0x30f   : > { %v2179_v44 = vmax.f32 %v2119_v40, 0.0  ;;  %v2122_v45 = vadd.f32 %v3122_v43, %v3906_v27  ;;  %v2113_v46 = vpop.f32.mrb[51].mxu1 }
 0x310   : > { %v2177_v47 = vmax.f32 %v2111_v42, 0.0  ;;  %v2114_v48 = vadd.f32 %v3906_v27, %v2113_v46 }
 0x311   : > { %v2207_v49 = vmax.f32 %v2203_v33, %v2179_v44  ;;  %v2180_v50 = vmax.f32 %v2122_v45, 0.0 }
 0x312   : > { %v2205_v51 = vmax.f32 %v2201_v35, %v2177_v47  ;;  %v2178_v52 = vmax.f32 %v2114_v48, 0.0 }
 0x313   : > { %v2208_v53 = vmax.f32 %v2204_v37, %v2180_v50 }
 0x314   : > { %v2206_v54 = vmax.f32 %v2202_v38, %v2178_v52  ;;  %v3125_v55 = vpop.f32.mrb[52].mxu1 }
 0x315   : > { %v2135_v56 = vadd.f32 %v3125_v55, %v3906_v27  ;;  %v2126_v57 = vpop.f32.mrb[53].mxu1 }
 0x316   : > { %v2127_v58 = vadd.f32 %v3906_v27, %v2126_v57  ;;  %v3126_v59 = vpop.f32.mrb[54].mxu1  ;;  %v2945_v28 = vpop.f32.mrb[68].mxu0 }
 0x317   : > { %v2183_v60 = vmax.f32 %v2135_v56, 0.0  ;;  %v2138_v61 = vadd.f32 %v3126_v59, %v3906_v27  ;;  %v2129_v62 = vpop.f32.mrb[55].mxu1  ;;  %v2946_v63 = vpop.f32.mrb[69].mxu0 }
 0x318   : > { %v2181_v1 = vmax.f32 %v2127_v58, 0.0  ;;  %v2130_v2 = vadd.f32 %v3906_v27, %v2129_v62  ;;  %v3936_v3 = vadd.f32 %v2946_v63, %v2945_v28  ;;  %v2948_v4 = vpop.f32.mrb[70].mxu0 }
 0x319   : > { %v2211_v5 = vmax.f32 %v2207_v49, %v2183_v60  ;;  %v2184_v6 = vmax.f32 %v2138_v61, 0.0  ;;  %v2949_v7 = vpop.f32.mrb[71].mxu0 }
 0x31a   : > { %v2209_v0 = vmax.f32 %v2205_v51, %v2181_v1  ;;  %v2182_v8 = vmax.f32 %v2130_v2, 0.0  ;;  %v3938_v9 = vadd.f32 %v2949_v7, %v2948_v4 }
 0x31b   : > { %v2212_v10 = vmax.f32 %v2208_v53, %v2184_v6 }
 0x31c   : > { %v2210_v11 = vmax.f32 %v2206_v54, %v2182_v8  ;;  %v3129_v12 = vpop.f32.mrb[56].mxu1 }
 0x31d   : > { %v2151_v13 = vadd.f32 %v3129_v12, %v3906_v27  ;;  %v2142_v14 = vpop.f32.mrb[57].mxu1 }
 0x31e   : > { %v2143_v15 = vadd.f32 %v3906_v27, %v2142_v14  ;;  %v3130_v32 = vpop.f32.mrb[58].mxu1  ;;  %v2951_v31 = vpop.f32.mrb[72].mxu0 }
 0x31f   : > { %v2187_v16 = vmax.f32 %v2151_v13, 0.0  ;;  %v2154_v17 = vadd.f32 %v3130_v32, %v3906_v27  ;;  %v2145_v18 = vpop.f32.mrb[59].mxu1 }
 0x320   : > { %v2185_v19 = vmax.f32 %v2143_v15, 0.0  ;;  %v2146_v20 = vadd.f32 %v3906_v27, %v2145_v18  ;;  %v2952_v27 = vpop.f32.mrb[73].mxu0 }
 0x321   : > { %v2215_v21 = vmax.f32 %v2211_v5, %v2187_v16  ;;  %v2188_v22 = vmax.f32 %v2154_v17, 0.0  ;;  %v2953_v33 = vadd.f32 %v2952_v27, %v2951_v31  ;;  %v2954_v34 = vpop.f32.mrb[74].mxu0 }
 0x322   : > { %v2213_v23 = vmax.f32 %v2209_v0, %v2185_v19  ;;  %v2186_v24 = vmax.f32 %v2146_v20, 0.0  ;;  %v2955_v35 = vpop.f32.mrb[75].mxu0 }
 0x323   : > { %2219 = vst [vmem:[%s3867_s1 + $0x28] sm:$0xff] %v2215_v21  ;;  %v2216_v25 = vmax.f32 %v2212_v10, %v2188_v22  ;;  %v2956_v36 = vadd.f32 %v2955_v35, %v2954_v34 }
 0x324   : > { %2217 = vst [vmem:[%s3867_s1 + $0x8] sm:$0xff] %v2213_v23  ;;  %v2214_v26 = vmax.f32 %v2210_v11, %v2186_v24 }
 0x325   : > { %2220 = vst [vmem:[%s3867_s1 + $0x38] sm:$0xff] %v2216_v25  ;;  %v2222_v29 = vpack.c.bf16 %v2216_v25, %v2215_v21 }
 0x326   : > { %2218 = vst [vmem:[%s3867_s1 + $0x18] sm:$0xff] %v2214_v26  ;;  %v2221_v30 = vpack.c.bf16 %v2214_v26, %v2213_v23  ;;  %s3297_s1 = scalar_lea.vmem %s3296_s18, 2048 }
 0x327   : > { %p3299_p4 = scmp.lt.s32.totalorder %s3297_s1, %s3291_s23 }
 0x328   : > { %3147 = vmatprep.mubr.bf16.mxu1 %v2221_v30 }
 0x329   : > { %3148 = vmatmul.mubr.bf16.vlgmr.msra.gmra.mrb[60].mxu1 %v2222_v29  ;;  %p3300_p5 = por %p3299_p4, %p3298_p3 }
 0x32b   : > { %p3301_p7 = pnand %p3300_p5, %p3294_p2 }
 0x32d   : > { %3304 = shalt.err (!%p3301_p7)
}
 0x32e   : > { %s3305_s4 = scalar_lea.hbm %s3953_s28, 1024  ;;  %s3309_s21 = scalar_lea.hbm %s4050_s13, 2048 }
 0x32f   : > { %p3306_p10 = scmp.ne.s32.totalorder %s3953_s28, %s3305_s4  ;;  %p3310_p13 = scmp.lt.u32.totalorder %s3953_s28, %s4050_s13 }
 0x330   : > { %p3311_p0 = scmp.lt.u32.totalorder %s3309_s21, %s3305_s4  ;;  %p3313_p2 = scmp.lt.u32.totalorder %s3305_s4, %s3953_s28 }
 0x331   : > { %p3307_p11 = pnand %p3306_p10, %p3512_p6 }
 0x332   : > { %p3312_p1 = por %p3311_p0, %p3310_p13 }
 0x333   : > { %p3308_p12 = pneg %p3307_p11 }
 0x334   : > { %p3314_p3 = por %p3313_p2, %p3312_p1 }
 0x336   : > { %p3315_p4 = pnand %p3314_p3, %p3308_p12 }
 0x338   : > { %3318 = shalt.err (!%p3315_p4)
}
 0x339   : > { %s3389_s23 = smov 256   ;;  %s3390_s1 = smov 16   ;;  %v2808_v37 = vld [vmem:[%s4049_s12] ss:$0 sm:$0xff] }
 0x33a   : > { %3168 = dma.vmem_to_hbm [thread:$0]  (%p3512_p6), %s3955_s27, 1024, %s3953_s28, %s2541_s3, %s3389_s23, %s3389_s23, %s3390_s1   ;;  %v2477_v38 = vadd.f32 %v2953_v33, %v2808_v37  ;;  %v2469_v40 = vadd.f32 %v3936_v3, %v2808_v37  ;;  %v2480_v43 = vadd.f32 %v2956_v36, %v2808_v37  ;;  %v2472_v46 = vadd.f32 %v3938_v9, %v2808_v37 }
 0x33b   : > { %s2719_s21 = sshll.u32 %s3579_s26, 5  ;;  %s2846_s27 = sshll.u32 %s3490_s17, 9 }
 0x33c   : > { %s844_s4 = scalar_lea.vmem [#allocation6], %s2719_s21  ;;  %s3993_s18 = scalar_lea.hbm %s4051_s14, %s2846_s27 }
 0x33d   : > { %s2576_s20 = sshll.u32 %s844_s4, 4  ;;  %s2546_s23 = scalar_lea.sflag [#allocation7], %s3579_s26  ;;  %s3988_s20 = int_to_ptr.vmem [resolvable:$true] %s2576_s20 }
 0x33e   : > { %s3319_s17 = scalar_lea.vmem %s3988_s20, 512  ;;  %s3391_s1 = smov [#allocation6]  }
 0x33f   : > { %p3320_p5 = scmp.ne.s32.totalorder %s3988_s20, %s3319_s17  ;;  %s3323_s22 = sshll.u32 %s3391_s1, 4  ;;  %s3324_s22 = int_to_ptr.vmem [resolvable:$false] %s3323_s22 }
 0x340   : > { %s3325_s2 = scalar_lea.vmem %s3324_s22, 1024  ;;  %p3326_p11 = scmp.lt.s32.totalorder %s3988_s20, %s3324_s22 }
 0x341   : > { %p3321_p7 = pnand %p3320_p5, %p3512_p6  ;;  %p3327_p12 = scmp.lt.s32.totalorder %s3325_s2, %s3319_s17 }
 0x343   : > { %p3322_p10 = pneg %p3321_p7  ;;  %p3328_p13 = por %p3327_p12, %p3326_p11 }
 0x345   : > { %p3329_p0 = pnand %p3328_p13, %p3322_p10 }
 0x3fc   : > { %v3149_v39 = vpop.f32.mrb[60].mxu1 }
 0x3fd   : > { %v2526_v41 = vadd.f32 %v3149_v39, %v2477_v38  ;;  %v2517_v42 = vpop.f32.mrb[61].mxu1 }
 0x3fe   : > { %v2518_v44 = vadd.f32 %v2517_v42, %v2469_v40  ;;  %v3150_v45 = vpop.f32.mrb[62].mxu1 }
 0x3ff   : > { %v2534_v47 = vmax.f32 %v2526_v41, 0.0  ;;  %v2529_v48 = vadd.f32 %v3150_v45, %v2480_v43  ;;  %v2520_v49 = vpop.f32.mrb[63].mxu1 }
 0x400   : > { %v2532_v50 = vmax.f32 %v2518_v44, 0.0  ;;  %v2521_v51 = vadd.f32 %v2520_v49, %v2472_v46 }
 0x401   : > { %2538 = vst [vmem:[%s844_s4 + $0x10] sm:$0xff] %v2534_v47  ;;  %v2535_v52 = vmax.f32 %v2529_v48, 0.0 }
 0x402   : > { %2536 = vst [vmem:[%s844_s4] sm:$0xff] %v2532_v50  ;;  %v2533_v53 = vmax.f32 %v2521_v51, 0.0 }
 0x403   : > { %2539 = vst [vmem:[%s844_s4 + $0x18] sm:$0xff] %v2535_v52 }
 0x404   : > { %2537 = vst [vmem:[%s844_s4 + $0x8] sm:$0xff] %v2533_v53 }
 0x405   : > { %3332 = shalt.err (!%p3329_p0)
}
 0x406   : > { %s3333_s21 = scalar_lea.hbm %s3993_s18, 512  ;;  %s3337_s28 = scalar_lea.hbm %s4051_s14, 1024 }
 0x407   : > { %p3334_p1 = scmp.ne.s32.totalorder %s3993_s18, %s3333_s21  ;;  %p3338_p4 = scmp.lt.u32.totalorder %s3993_s18, %s4051_s14 }
 0x408   : > { %p3339_p5 = scmp.lt.u32.totalorder %s3337_s28, %s3333_s21  ;;  %p3341_p10 = scmp.lt.u32.totalorder %s3333_s21, %s3993_s18 }
 0x409   : > { %p3335_p2 = pnand %p3334_p1, %p3512_p6 }
 0x40a   : > { %p3340_p7 = por %p3339_p5, %p3338_p4 }
 0x40b   : > { %p3336_p3 = pneg %p3335_p2 }
 0x40c   : > { %p3342_p11 = por %p3341_p10, %p3340_p7 }
 0x40e   : > { %p3343_p12 = pnand %p3342_p11, %p3336_p3 }
 0x410   : > { %3346 = shalt.err (!%p3343_p12)
}
 0x411   : > { %s3392_s17 = smov 128   ;;  %s3393_s22 = smov 8  }
 0x412   : > { %3169 = dma.vmem_to_hbm [thread:$0]  (%p3512_p6), %s3988_s20, 512, %s3993_s18, %s2546_s23, %s3392_s17, %s3392_s17, %s3393_s22  }
 0x413 PF: > { %s2591_s2 = sand.u32 1, %s3373_s29   ;;  %p3173_p13 = pnand %p2708_p9, %p3516_p8 }
 0x414   : > { %s2592_s21 = scalar_lea.sflag [#allocation5], %s2591_s2 }
 0x415   : > { %3364 = dma.done.wait (!%p3173_p13), %s2592_s21, 1024  }
 0x416   : > { %3366 = vsyncadd (!%p3173_p13), %s2592_s21, 4294966272  ;;  %s2601_s4 = scalar_lea.sflag [#allocation7], %s2591_s2 }
 0x417   : > { %3368 = dma.done.wait (!%p3173_p13), %s2601_s4, 512  }
 0x418   : > { %3370 = vsyncadd (!%p3173_p13), %s2601_s4, 4294966784  ;;  %s4064_s24 = sld [smem:[#allocation10_spill]]  ;;  %p28_p6 = scmp.ge.s32.totalorder %s3494_s19, 4  }
 0x419   : > { %s4065_s29 = smov %s3377_s30  ;;  %s4066_s30 = smov %s3381_s15 }
 0x41a   : > { %s4068_s16 = smov %s3494_s19  ;;  %30 = sbr.rel (!%p28_p6) target bundleno = 10 (0xa), region = 222 }
 0x41e   : > { %s4067_s15 = smov %s4064_s24 }
 0x421   :  { %2606 = vsyncpa [#allocation5], 1 }
 0x422   :  { %2608 = vsyncpa [#allocation5 + $0x1], 1 }
 0x423   :  { %2609 = vsyncpa [#allocation7], 1 }
 0x424   :  { %2611 = vsyncpa [#allocation7 + $0x1], 1 }

</bundles_post_ra>
